<compile_context>
chip_gen: v5e
topology: v5e:2x2
jax: 0.10.0
libtpu: 0.0.40
codegen_flags: <defaults>
</compile_context>

<pallas_src>
import jax
import jax.numpy as jnp
from jax import lax
from jax.experimental import pallas as pl
from jax.experimental.pallas import tpu as pltpu


_LANE = 128  # TPU lane width; the 1-wide Q output is padded to this for lane-dense stores.


def _round_up(x, m):
    return (x + m - 1) // m * m


def _default_grid_steps():
    """One grid step per TensorCore: 2 on v7x (2 TCs/chip), else 1."""
    try:
        kind = jax.devices()[0].device_kind.lower()
    except Exception:  # pragma: no cover - defensive
        kind = ""
    return 2 if "v7" in kind else 1


def _qfunc_kernel(x_ref, w1_ref, b1_ref, w2_ref, b2_ref, w3_ref, b3_ref, out_ref):
    # Layer 1: Linear(K = obs_dim + act_dim) + ReLU.  Single MXU pass.
    h = jnp.dot(x_ref[...], w1_ref[...], preferred_element_type=jnp.float32)
    h = jnp.maximum(h + b1_ref[...], 0.0)

    # Layer 2: Linear + ReLU.
    h = jnp.dot(h, w2_ref[...], preferred_element_type=jnp.float32)
    h = jnp.maximum(h + b2_ref[...], 0.0)

    # Output layer into a lane-dense (TB, 128) block.  Only column 0 is the
    # real Q value (W3 / b3 are zero-padded); the wrapper slices it out.
    out_ref[...] = (jnp.dot(h, w3_ref[...], preferred_element_type=jnp.float32)
                    + b3_ref[...])


def prepare_params(params):
    """One-time conversion of (w1, b1, w2, b2, w3, b3) into kernel layout.

    Do this ONCE (e.g. after each optimizer step), not per forward call.
    """
    w1, b1, w2, b2, w3, b3 = params
    H2 = w2.shape[1]
    w1 = jnp.asarray(w1, jnp.float32)
    b1 = jnp.asarray(b1, jnp.float32).reshape(1, -1)
    w2 = jnp.asarray(w2, jnp.float32)
    b2 = jnp.asarray(b2, jnp.float32).reshape(1, -1)
    # Zero-pad the 1-wide output head to the lane width -> unmasked full-lane stores.
    w3_pad = jnp.zeros((H2, _LANE), jnp.float32).at[:, :1].set(
        jnp.asarray(w3, jnp.float32).reshape(H2, 1))
    b3_pad = jnp.zeros((1, _LANE), jnp.float32).at[:, :1].set(
        jnp.asarray(b3, jnp.float32).reshape(1, 1))
    return (w1, b1, w2, b2, w3_pad, b3_pad)


def mlp_q_function(obs, act, prepared, *, grid_steps=None):
    """Pallas implementation of MLPQFunction.forward(obs, act) -> q of shape (B,)."""
    w1, b1, w2, b2, w3_pad, b3_pad = prepared
    B = obs.shape[0]
    in_dim = w1.shape[0]          # obs_dim + act_dim
    H1 = w1.shape[1]
    H2 = w2.shape[1]

    if grid_steps is None:
        grid_steps = _default_grid_steps()

    # One batch tile per TensorCore; TB multiple of 8 (f32 sublane packing).
    TB = _round_up(pl.cdiv(B, grid_steps), 8)
    B_pad = TB * grid_steps

    # torch.cat([obs, act], dim=-1) — tiny, XLA-fusable; keeps W1 whole (K = in_dim).
    x = jnp.concatenate([obs.astype(jnp.float32), act.astype(jnp.float32)], axis=-1)
    if B_pad != B:
        x = jnp.pad(x, ((0, B_pad - B), (0, 0)))

    def resident_spec(a):
        # Full-array block, same block index every grid step -> stays VMEM-resident.
        return pl.BlockSpec(a.shape, lambda i: (0, 0))

    flops = 2 * B_pad * (in_dim * H1 + H1 * H2 + H2 * _LANE)
    bytes_accessed = (
        B_pad * in_dim * 4                                              # f32 activations in
        + (w1.size + w2.size + w3_pad.size + b1.size + b2.size + b3_pad.size) * 4
        + B_pad * _LANE * 4                                             # f32 output
    )

    out = pl.pallas_call(
        _qfunc_kernel,
        out_shape=jax.ShapeDtypeStruct((B_pad, _LANE), jnp.float32),
        grid=(grid_steps,),
        in_specs=[
            pl.BlockSpec((TB, in_dim), lambda i: (i, 0)),
            resident_spec(w1), resident_spec(b1),
            resident_spec(w2), resident_spec(b2),
            resident_spec(w3_pad), resident_spec(b3_pad),
        ],
        out_specs=pl.BlockSpec((TB, _LANE), lambda i: (i, 0)),
        compiler_params=pltpu.CompilerParams(
            dimension_semantics=("parallel",)),
        cost_estimate=pl.CostEstimate(flops=flops, transcendentals=0,
                                      bytes_accessed=bytes_accessed),
    )(x, w1, b1, w2, b2, w3_pad, b3_pad)

    # torch.squeeze(q, -1): real (column-0) Q values, padded batch rows dropped.
    return out[:B, 0]


def init_params(key, obs_dim, act_dim, hidden_sizes):
    """Deterministic init matching q_network_sizes = [obs_dim + act_dim] + hidden + [1]."""
    sizes = [obs_dim + act_dim] + list(hidden_sizes) + [1]
    params = []
    for i in range(len(sizes) - 1):
        key, kw, kb = jax.random.split(key, 3)
        bound = 1.0 / jnp.sqrt(sizes[i])  # PyTorch nn.Linear default-style bound
        w = jax.random.uniform(kw, (sizes[i], sizes[i + 1]),
                               minval=-bound, maxval=bound, dtype=jnp.float32)
        b = jax.random.uniform(kb, (1, sizes[i + 1]),
                               minval=-bound, maxval=bound, dtype=jnp.float32)
        params += [w, b]
    return tuple(params)


if __name__ == "__main__":
    key = jax.random.PRNGKey(0)
    B, OBS_DIM, ACT_DIM = 512, 12, 4
    HIDDEN = (32, 32)

    k_obs, k_act, k_par = jax.random.split(key, 3)
    obs = jax.random.normal(k_obs, (B, OBS_DIM), dtype=jnp.float32)
    act = jax.random.normal(k_act, (B, ACT_DIM), dtype=jnp.float32)
    params = init_params(k_par, OBS_DIM, ACT_DIM, HIDDEN)

    # One-time parameter preparation (outside the per-step hot path).
    prepared = prepare_params(params)

    q_fn = jax.jit(lambda o, a, p: mlp_q_function(o, a, p))
    q = jax.block_until_ready(q_fn(obs, act, prepared))

    # Pure-JAX f32 reference (highest precision).  Tolerance is loose enough
    # to cover possible reduced-precision MXU passes inside the kernel while
    # still catching structural errors.
    w1, b1, w2, b2, w3, b3 = params
    x = jnp.concatenate([obs, act], axis=-1)
    h = jnp.maximum(jnp.dot(x, w1, precision=lax.Precision.HIGHEST) + b1, 0.0)
    h = jnp.maximum(jnp.dot(h, w2, precision=lax.Precision.HIGHEST) + b2, 0.0)
    q_ref = jnp.squeeze(jnp.dot(h, w3, precision=lax.Precision.HIGHEST) + b3, axis=-1)

    assert q.shape == (B,)
    assert jnp.allclose(q, q_ref, atol=1e-2, rtol=1e-2), float(jnp.max(jnp.abs(q - q_ref)))

    print("KERNEL_OK")
</pallas_src>

<mosaic_0001>
module attributes {stable_mosaic.version = 11 : i64} {
  func.func @_qfunc_kernel(%arg0: i32, %arg1: memref<512x16xf32, #tpu.memory_space<vmem>>, %arg2: memref<16x32xf32, #tpu.memory_space<vmem>>, %arg3: memref<1x32xf32, #tpu.memory_space<vmem>>, %arg4: memref<32x32xf32, #tpu.memory_space<vmem>>, %arg5: memref<1x32xf32, #tpu.memory_space<vmem>>, %arg6: memref<32x128xf32, #tpu.memory_space<vmem>>, %arg7: memref<1x128xf32, #tpu.memory_space<vmem>>, %arg8: memref<512x128xf32, #tpu.memory_space<vmem>>) attributes {dimension_semantics = [#tpu.dimension_semantics<parallel>], iteration_bounds = array<i64: 1>, scalar_prefetch = 0 : i64, scratch_operands = 0 : i64, tpu.core_type = #tpu.core_type<tc>, window_params = [{transform_indices = @transform_0, window_bounds = array<i64: 512, 16>}, {pipeline_mode = #tpu.pipeline_mode<synchronous>, transform_indices = @transform_1, window_bounds = array<i64: 16, 32>}, {pipeline_mode = #tpu.pipeline_mode<synchronous>, transform_indices = @transform_2, window_bounds = array<i64: 1, 32>}, {pipeline_mode = #tpu.pipeline_mode<synchronous>, transform_indices = @transform_3, window_bounds = array<i64: 32, 32>}, {pipeline_mode = #tpu.pipeline_mode<synchronous>, transform_indices = @transform_4, window_bounds = array<i64: 1, 32>}, {pipeline_mode = #tpu.pipeline_mode<synchronous>, transform_indices = @transform_5, window_bounds = array<i64: 32, 128>}, {pipeline_mode = #tpu.pipeline_mode<synchronous>, transform_indices = @transform_6, window_bounds = array<i64: 1, 128>}, {transform_indices = @transform_7, window_bounds = array<i64: 512, 128>}]} {
    %c0 = arith.constant 0 : index
    %c0_0 = arith.constant 0 : index
    %0 = vector.load %arg1[%c0, %c0_0] : memref<512x16xf32, #tpu.memory_space<vmem>>, vector<512x16xf32>
    %c0_1 = arith.constant 0 : index
    %c0_2 = arith.constant 0 : index
    %1 = vector.load %arg2[%c0_1, %c0_2] : memref<16x32xf32, #tpu.memory_space<vmem>>, vector<16x32xf32>
    %cst = arith.constant dense<0.000000e+00> : vector<512x32xf32>
    %2 = tpu.matmul %0, %1, %cst {dimension_numbers = #tpu.dot_dimension_numbers<[1], [0], [0], [1], [0, 0, 1, 1], [], []>} : vector<512x16xf32>, vector<16x32xf32>, vector<512x32xf32> -> vector<512x32xf32>
    %c0_3 = arith.constant 0 : index
    %c0_4 = arith.constant 0 : index
    %3 = vector.load %arg3[%c0_3, %c0_4] : memref<1x32xf32, #tpu.memory_space<vmem>>, vector<1x32xf32>
    %4 = vector.broadcast %3 : vector<1x32xf32> to vector<512x32xf32>
    %5 = arith.addf %2, %4 : vector<512x32xf32>
    %cst_5 = arith.constant 0.000000e+00 : f32
    %6 = vector.broadcast %cst_5 : f32 to vector<512x32xf32>
    %7 = arith.maximumf %5, %6 : vector<512x32xf32>
    %c0_6 = arith.constant 0 : index
    %c0_7 = arith.constant 0 : index
    %8 = vector.load %arg4[%c0_6, %c0_7] : memref<32x32xf32, #tpu.memory_space<vmem>>, vector<32x32xf32>
    %cst_8 = arith.constant dense<0.000000e+00> : vector<512x32xf32>
    %9 = tpu.matmul %7, %8, %cst_8 {dimension_numbers = #tpu.dot_dimension_numbers<[1], [0], [0], [1], [0, 0, 1, 1], [], []>} : vector<512x32xf32>, vector<32x32xf32>, vector<512x32xf32> -> vector<512x32xf32>
    %c0_9 = arith.constant 0 : index
    %c0_10 = arith.constant 0 : index
    %10 = vector.load %arg5[%c0_9, %c0_10] : memref<1x32xf32, #tpu.memory_space<vmem>>, vector<1x32xf32>
    %11 = vector.broadcast %10 : vector<1x32xf32> to vector<512x32xf32>
    %12 = arith.addf %9, %11 : vector<512x32xf32>
    %cst_11 = arith.constant 0.000000e+00 : f32
    %13 = vector.broadcast %cst_11 : f32 to vector<512x32xf32>
    %14 = arith.maximumf %12, %13 : vector<512x32xf32>
    %c0_12 = arith.constant 0 : index
    %c0_13 = arith.constant 0 : index
    %15 = vector.load %arg6[%c0_12, %c0_13] : memref<32x128xf32, #tpu.memory_space<vmem>>, vector<32x128xf32>
    %cst_14 = arith.constant dense<0.000000e+00> : vector<512x128xf32>
    %16 = tpu.matmul %14, %15, %cst_14 {dimension_numbers = #tpu.dot_dimension_numbers<[1], [0], [0], [1], [0, 0, 1, 1], [], []>} : vector<512x32xf32>, vector<32x128xf32>, vector<512x128xf32> -> vector<512x128xf32>
    %c0_15 = arith.constant 0 : index
    %c0_16 = arith.constant 0 : index
    %17 = vector.load %arg7[%c0_15, %c0_16] : memref<1x128xf32, #tpu.memory_space<vmem>>, vector<1x128xf32>
    %18 = vector.broadcast %17 : vector<1x128xf32> to vector<512x128xf32>
    %19 = arith.addf %16, %18 : vector<512x128xf32>
    %c0_17 = arith.constant 0 : index
    %c0_18 = arith.constant 0 : index
    %20 = vector.load %arg8[%c0_17, %c0_18] : memref<512x128xf32, #tpu.memory_space<vmem>>, vector<512x128xf32>
    tpu.vector_store %arg8[%c0_17, %c0_18], %19 {strides = array<i32>} : memref<512x128xf32, #tpu.memory_space<vmem>>, vector<512x128xf32>,
    return
  }
  func.func @transform_0(%arg0: i32) -> (i32, i32) {
    %c0_i32 = arith.constant 0 : i32
    %c0_i32_0 = arith.constant 0 : i32
    return %arg0, %c0_i32 : i32, i32
  }
  func.func @transform_1(%arg0: i32) -> (i32, i32) {
    %c0_i32 = arith.constant 0 : i32
    %c0_i32_0 = arith.constant 0 : i32
    %c0_i32_1 = arith.constant 0 : i32
    return %c0_i32, %c0_i32_0 : i32, i32
  }
  func.func @transform_2(%arg0: i32) -> (i32, i32) {
    %c0_i32 = arith.constant 0 : i32
    %c0_i32_0 = arith.constant 0 : i32
    %c0_i32_1 = arith.constant 0 : i32
    return %c0_i32, %c0_i32_0 : i32, i32
  }
  func.func @transform_3(%arg0: i32) -> (i32, i32) {
    %c0_i32 = arith.constant 0 : i32
    %c0_i32_0 = arith.constant 0 : i32
    %c0_i32_1 = arith.constant 0 : i32
    return %c0_i32, %c0_i32_0 : i32, i32
  }
  func.func @transform_4(%arg0: i32) -> (i32, i32) {
    %c0_i32 = arith.constant 0 : i32
    %c0_i32_0 = arith.constant 0 : i32
    %c0_i32_1 = arith.constant 0 : i32
    return %c0_i32, %c0_i32_0 : i32, i32
  }
  func.func @transform_5(%arg0: i32) -> (i32, i32) {
    %c0_i32 = arith.constant 0 : i32
    %c0_i32_0 = arith.constant 0 : i32
    %c0_i32_1 = arith.constant 0 : i32
    return %c0_i32, %c0_i32_0 : i32, i32
  }
  func.func @transform_6(%arg0: i32) -> (i32, i32) {
    %c0_i32 = arith.constant 0 : i32
    %c0_i32_0 = arith.constant 0 : i32
    %c0_i32_1 = arith.constant 0 : i32
    return %c0_i32, %c0_i32_0 : i32, i32
  }
  func.func @transform_7(%arg0: i32) -> (i32, i32) {
    %c0_i32 = arith.constant 0 : i32
    %c0_i32_0 = arith.constant 0 : i32
    return %arg0, %c0_i32 : i32, i32
  }
}

</mosaic_0001>

<bundles_post_ra>
// kernel: _lambda_.1
= control target key start
LH: loop header
LB: loop body
LE: loop exit
PB: predicated region body
PF: predicated region fallthrough
CT: control target
= control target key end

     0   :  { %vm96_vm0 = vcmask 130048   ;;  %vm570_vm1 = vcmask 261120   ;;  %s2598_s1 = inlined_call_operand.vmem [shape: f32[16,32], index: 1, kind: input, shape index: {}]   ;;  %s2599_s0 = inlined_call_operand.vmem [shape: f32[512,16], index: 0, kind: input, shape index: {}]   ;;  %s2600_s2 = inlined_call_operand.vmem [shape: f32[1,32], index: 2, kind: input, shape index: {}]   ;;  %s2601_s3 = inlined_call_operand.vmem [shape: f32[32,32], index: 3, kind: input, shape index: {}]   ;;  %s2602_s4 = inlined_call_operand.vmem [shape: f32[1,32], index: 4, kind: input, shape index: {}]   ;;  %s2603_s5 = inlined_call_operand.vmem [shape: f32[32,128], index: 5, kind: input, shape index: {}]   ;;  %s2604_s6 = inlined_call_operand.vmem [shape: f32[1,128], index: 6, kind: input, shape index: {}]   ;;  %s2605_s7 = inlined_call_operand.vmem [shape: f32[512,128], index: 7, kind: output, shape index: {}]  }
   0x1   :  { %v91_v0 = vld [vmem:[%s2598_s1 + $0x8] sm:$0xff]  ;;  %v90_v1 = vld [vmem:[%s2598_s1] sm:$0xff]  ;;  %v28_v4 = vld [vmem:[%s2599_s0 + $0x10] sm:$0xff] }
   0x2   :  { %303 = vmatpush.msra.mxu0 %v91_v0  ;;  %v26_v2 = vld [vmem:[%s2599_s0] sm:$0xff]  ;;  %1705 = vmatpush.msra.mxu3 %v91_v0  ;;  %v27_v3 = vld [vmem:[%s2599_s0 + $0x8] sm:$0xff]  ;;  %v29_v5 = vld [vmem:[%s2599_s0 + $0x18] sm:$0xff] }
   0x3   :  { %v30_v6 = vld [vmem:[%s2599_s0 + $0x20] sm:$0xff]  ;;  %v31_v7 = vld [vmem:[%s2599_s0 + $0x28] sm:$0xff]  ;;  %v32_v8 = vld [vmem:[%s2599_s0 + $0x30] sm:$0xff] }
   0x4   :  { %304 = vmatpush.msra.mxu0 %v90_v1  ;;  %1706 = vmatpush.msra.mxu3 %v90_v1  ;;  %v33_v9 = vld [vmem:[%s2599_s0 + $0x38] sm:$0xff]  ;;  %v34_v10 = vld [vmem:[%s2599_s0 + $0x40] sm:$0xff]  ;;  %v35_v11 = vld [vmem:[%s2599_s0 + $0x48] sm:$0xff] }
   0x5   :  { %1513 = vmatmul.msk.f32.vlgmr.msra.gmra.mxu0 %vm96_vm0, %v26_v2  ;;  %v36_v12 = vld [vmem:[%s2599_s0 + $0x50] sm:$0xff]  ;;  %v37_v13 = vld [vmem:[%s2599_s0 + $0x58] sm:$0xff]  ;;  %v38_v16 = vld [vmem:[%s2599_s0 + $0x60] sm:$0xff] }
   0x6   :  { %v565_v14 = vld [vmem:[%s2601_s3 + $0x18] sm:$0xff]  ;;  %v564_v15 = vld [vmem:[%s2601_s3 + $0x10] sm:$0xff]  ;;  %v563_v17 = vld [vmem:[%s2601_s3 + $0x8] sm:$0xff] }
   0x7   :  { %775 = vmatpush.msra.mxu1 %v565_v14  ;;  %1707 = vmatpush.msrb.mxu3 %v565_v14  ;;  %v562_v18 = vld [vmem:[%s2601_s3] sm:$0xff]  ;;  %v39_v19 = vld [vmem:[%s2599_s0 + $0x68] sm:$0xff]  ;;  %v40_v20 = vld [vmem:[%s2599_s0 + $0x70] sm:$0xff] }
   0x8   :  { %v41_v21 = vld [vmem:[%s2599_s0 + $0x78] sm:$0xff]  ;;  %v1846_v22 = vld [vmem:[%s2600_s2] ss:$0 sm:$0xff]  ;;  %v43_v28 = vld [vmem:[%s2599_s0 + $0x88] sm:$0xff] }
   0x9   :  { %776 = vmatpush.msra.mxu1 %v564_v15  ;;  %1708 = vmatpush.msrb.mxu3 %v564_v15  ;;  %v42_v24 = vld [vmem:[%s2599_s0 + $0x80] sm:$0xff]  ;;  %v44_v32 = vld [vmem:[%s2599_s0 + $0x90] sm:$0xff]  ;;  %v45_v36 = vld [vmem:[%s2599_s0 + $0x98] sm:$0xff] }
   0xa   :  { %v46_v40 = vld [vmem:[%s2599_s0 + $0xa0] sm:$0xff]  ;;  %v47_v44 = vld [vmem:[%s2599_s0 + $0xa8] sm:$0xff]  ;;  %v48_v48 = vld [vmem:[%s2599_s0 + $0xb0] sm:$0xff] }
   0xb   :  { %777 = vmatpush.msra.mxu1 %v563_v17  ;;  %1709 = vmatpush.msrb.mxu3 %v563_v17  ;;  %v49_v52 = vld [vmem:[%s2599_s0 + $0xb8] sm:$0xff]  ;;  %v50_v56 = vld [vmem:[%s2599_s0 + $0xc0] sm:$0xff]  ;;  %v51_v60 = vld [vmem:[%s2599_s0 + $0xc8] sm:$0xff] }
   0xc   :  { %v52_v0 = vld [vmem:[%s2599_s0 + $0xd0] sm:$0xff]  ;;  %v1947_v14 = vld [vmem:[%s2603_s5] sm:$0xff] }
   0xd   :  { %1514 = vmatmul.msk.f32.gmra.mxu0 %vm96_vm0, %v27_v3  ;;  %778 = vmatpush.msra.mxu1 %v562_v18 }
   0xe   :  { %1710 = vmatpush.msrb.mxu3 %v562_v18 }
  0x15   :  { %1515 = vmatmul.msk.f32.gmra.mxu0 %vm96_vm0, %v28_v4  ;;  %v53_v4 = vld [vmem:[%s2599_s0 + $0xd8] sm:$0xff] }
  0x1d   :  { %1516 = vmatmul.msk.f32.gmra.mxu0 %vm96_vm0, %v29_v5 }
  0x25   :  { %1517 = vmatmul.msk.f32.gmra.mxu0 %vm96_vm0, %v30_v6 }
  0x2d   :  { %1518 = vmatmul.msk.f32.gmra.mxu0 %vm96_vm0, %v31_v7  ;;  %v1923_v7 = vld [vmem:[%s2603_s5 + $0x18] sm:$0xff] }
  0x2e   :  { %1248 = vmatpush.msra.mxu2 %v1923_v7 }
  0x35   :  { %1519 = vmatmul.msk.f32.gmra.mxu0 %vm96_vm0, %v32_v8 }
  0x3d   :  { %1520 = vmatmul.msk.f32.gmra.mxu0 %vm96_vm0, %v33_v9  ;;  %v54_v9 = vld [vmem:[%s2599_s0 + $0xe0] sm:$0xff] }
  0x45   :  { %1521 = vmatmul.msk.f32.gmra.mxu0 %vm96_vm0, %v34_v10 }
  0x4d   :  { %1522 = vmatmul.msk.f32.gmra.mxu0 %vm96_vm0, %v35_v11  ;;  %v1933_v11 = vld [vmem:[%s2603_s5 + $0x10] sm:$0xff] }
  0x4e   :  { %1249 = vmatpush.msra.mxu2 %v1933_v11 }
  0x55   :  { %1523 = vmatmul.msk.f32.gmra.mxu0 %vm96_vm0, %v36_v12 }
  0x5d   :  { %1524 = vmatmul.msk.f32.gmra.mxu0 %vm96_vm0, %v37_v13  ;;  %v1940_v13 = vld [vmem:[%s2603_s5 + $0x8] sm:$0xff] }
  0x5e   :  { %1250 = vmatpush.msra.mxu2 %v1940_v13 }
  0x60   :  { %1251 = vmatpush.msra.mxu2 %v1947_v14 }
  0x65   :  { %1525 = vmatmul.msk.f32.gmra.mxu0 %vm96_vm0, %v38_v16  ;;  %v55_v16 = vld [vmem:[%s2599_s0 + $0xe8] sm:$0xff] }
  0x6d   :  { %1526 = vmatmul.msk.f32.gmra.mxu0 %vm96_vm0, %v39_v19 }
  0x75   :  { %1527 = vmatmul.msk.f32.gmra.mxu0 %vm96_vm0, %v40_v20  ;;  %v56_v20 = vld [vmem:[%s2599_s0 + $0xf0] sm:$0xff] }
  0x7d   :  { %1528 = vmatmul.msk.f32.gmra.mxu0 %vm96_vm0, %v41_v21 }
  0x82   :  { %v306_v23 = vpop.f32.mrf.mxu0 }
  0x83   :  { %v307_v25 = vadd.f32 %v1846_v22, %v306_v23 }
  0x85   :  { %v498_v26 = vmax.f32 %v307_v25, 0.0  ;;  %1529 = vmatmul.msk.f32.gmra.mxu0 %vm96_vm0, %v42_v24  ;;  %v57_v25 = vld [vmem:[%s2599_s0 + $0xf8] sm:$0xff] }
  0x87   :  { %1577 = vmatmul.msk.f32.vlgmr.msra.gmra.mxu1 %vm570_vm1, %v498_v26 }
  0x8a   :  { %v309_v27 = vpop.f32.mrf.mxu0 }
  0x8b   :  { %v310_v29 = vadd.f32 %v1846_v22, %v309_v27 }
  0x8d   :  { %v499_v30 = vmax.f32 %v310_v29, 0.0  ;;  %1530 = vmatmul.msk.f32.gmra.mxu0 %vm96_vm0, %v43_v28  ;;  %v1971_v28 = vld [vmem:[%s2602_s4] ss:$0 sm:$0xff] }
  0x8f   :  { %1578 = vmatmul.msk.f32.gmra.mxu1 %vm570_vm1, %v499_v30  ;;  %v58_v30 = vld [vmem:[%s2599_s0 + $0x100] sm:$0xff] }
  0x92   :  { %v312_v31 = vpop.f32.mrf.mxu0 }
  0x93   :  { %v313_v33 = vadd.f32 %v1846_v22, %v312_v31 }
  0x95   :  { %v500_v34 = vmax.f32 %v313_v33, 0.0  ;;  %1531 = vmatmul.msk.f32.gmra.mxu0 %vm96_vm0, %v44_v32 }
  0x97   :  { %1579 = vmatmul.msk.f32.gmra.mxu1 %vm570_vm1, %v500_v34 }
  0x9a   :  { %v315_v35 = vpop.f32.mrf.mxu0 }
  0x9b   :  { %v316_v37 = vadd.f32 %v1846_v22, %v315_v35 }
  0x9d   :  { %v501_v38 = vmax.f32 %v316_v37, 0.0  ;;  %1532 = vmatmul.msk.f32.gmra.mxu0 %vm96_vm0, %v45_v36  ;;  %v59_v37 = vld [vmem:[%s2599_s0 + $0x108] sm:$0xff] }
  0x9f   :  { %1580 = vmatmul.msk.f32.gmra.mxu1 %vm570_vm1, %v501_v38 }
  0xa2   :  { %v318_v39 = vpop.f32.mrf.mxu0 }
  0xa3   :  { %v319_v41 = vadd.f32 %v1846_v22, %v318_v39 }
  0xa5   :  { %v502_v42 = vmax.f32 %v319_v41, 0.0  ;;  %1533 = vmatmul.msk.f32.gmra.mxu0 %vm96_vm0, %v46_v40 }
  0xa7   :  { %1581 = vmatmul.msk.f32.gmra.mxu1 %vm570_vm1, %v502_v42 }
  0xaa   :  { %v321_v43 = vpop.f32.mrf.mxu0 }
  0xab   :  { %v322_v45 = vadd.f32 %v1846_v22, %v321_v43 }
  0xad   :  { %v503_v46 = vmax.f32 %v322_v45, 0.0  ;;  %1534 = vmatmul.msk.f32.gmra.mxu0 %vm96_vm0, %v47_v44  ;;  %v60_v44 = vld [vmem:[%s2599_s0 + $0x110] sm:$0xff] }
  0xaf   :  { %1582 = vmatmul.msk.f32.gmra.mxu1 %vm570_vm1, %v503_v46 }
  0xb2   :  { %v324_v47 = vpop.f32.mrf.mxu0 }
  0xb3   :  { %v325_v49 = vadd.f32 %v1846_v22, %v324_v47 }
  0xb5   :  { %v504_v50 = vmax.f32 %v325_v49, 0.0  ;;  %1535 = vmatmul.msk.f32.gmra.mxu0 %vm96_vm0, %v48_v48 }
  0xb7   :  { %1583 = vmatmul.msk.f32.gmra.mxu1 %vm570_vm1, %v504_v50 }
  0xba   :  { %v327_v51 = vpop.f32.mrf.mxu0 }
  0xbb   :  { %v328_v53 = vadd.f32 %v1846_v22, %v327_v51  ;;  %v61_v51 = vld [vmem:[%s2599_s0 + $0x118] sm:$0xff] }
  0xbd   :  { %v505_v54 = vmax.f32 %v328_v53, 0.0  ;;  %1536 = vmatmul.msk.f32.gmra.mxu0 %vm96_vm0, %v49_v52 }
  0xbf   :  { %1584 = vmatmul.msk.f32.gmra.mxu1 %vm570_vm1, %v505_v54 }
  0xc2   :  { %v330_v55 = vpop.f32.mrf.mxu0 }
  0xc3   :  { %v331_v57 = vadd.f32 %v1846_v22, %v330_v55 }
  0xc5   :  { %v506_v58 = vmax.f32 %v331_v57, 0.0  ;;  %1537 = vmatmul.msk.f32.gmra.mxu0 %vm96_vm0, %v50_v56 }
  0xc7   :  { %1585 = vmatmul.msk.f32.gmra.mxu1 %vm570_vm1, %v506_v58  ;;  %v62_v58 = vld [vmem:[%s2599_s0 + $0x120] sm:$0xff] }
  0xca   :  { %v333_v59 = vpop.f32.mrf.mxu0 }
  0xcb   :  { %v334_v61 = vadd.f32 %v1846_v22, %v333_v59 }
  0xcd   :  { %v507_v62 = vmax.f32 %v334_v61, 0.0  ;;  %1538 = vmatmul.msk.f32.gmra.mxu0 %vm96_vm0, %v51_v60 }
  0xcf   :  { %1586 = vmatmul.msk.f32.gmra.mxu1 %vm570_vm1, %v507_v62 }
  0xd2   :  { %v336_v63 = vpop.f32.mrf.mxu0 }
  0xd3   :  { %v337_v1 = vadd.f32 %v1846_v22, %v336_v63 }
  0xd5   :  { %v508_v2 = vmax.f32 %v337_v1, 0.0  ;;  %1539 = vmatmul.msk.f32.gmra.mxu0 %vm96_vm0, %v52_v0  ;;  %v63_v1 = vld [vmem:[%s2599_s0 + $0x128] sm:$0xff] }
  0xd7   :  { %1587 = vmatmul.msk.f32.gmra.mxu1 %vm570_vm1, %v508_v2 }
  0xda   :  { %v339_v3 = vpop.f32.mrf.mxu0 }
  0xdb   :  { %v340_v5 = vadd.f32 %v1846_v22, %v339_v3 }
  0xdd   :  { %v509_v6 = vmax.f32 %v340_v5, 0.0  ;;  %1540 = vmatmul.msk.f32.gmra.mxu0 %vm96_vm0, %v53_v4 }
  0xdf   :  { %1588 = vmatmul.msk.f32.gmra.mxu1 %vm570_vm1, %v509_v6 }
  0xe2   :  { %v342_v8 = vpop.f32.mrf.mxu0 }
  0xe3   :  { %v343_v10 = vadd.f32 %v1846_v22, %v342_v8 }
  0xe5   :  { %v510_v12 = vmax.f32 %v343_v10, 0.0  ;;  %1541 = vmatmul.msk.f32.gmra.mxu0 %vm96_vm0, %v54_v9  ;;  %v64_v9 = vld [vmem:[%s2599_s0 + $0x130] sm:$0xff] }
  0xe7   :  { %1589 = vmatmul.msk.f32.gmra.mxu1 %vm570_vm1, %v510_v12 }
  0xea   :  { %v345_v15 = vpop.f32.mrf.mxu0 }
  0xeb   :  { %v346_v17 = vadd.f32 %v1846_v22, %v345_v15 }
  0xed   :  { %v511_v18 = vmax.f32 %v346_v17, 0.0  ;;  %1542 = vmatmul.msk.f32.gmra.mxu0 %vm96_vm0, %v55_v16 }
  0xef   :  { %1590 = vmatmul.msk.f32.gmra.mxu1 %vm570_vm1, %v511_v18 }
  0xf2   :  { %v348_v19 = vpop.f32.mrf.mxu0 }
  0xf3   :  { %v349_v21 = vadd.f32 %v1846_v22, %v348_v19  ;;  %v65_v19 = vld [vmem:[%s2599_s0 + $0x138] sm:$0xff] }
  0xf5   :  { %v512_v23 = vmax.f32 %v349_v21, 0.0  ;;  %1543 = vmatmul.msk.f32.gmra.mxu0 %vm96_vm0, %v56_v20 }
  0xf7   :  { %1591 = vmatmul.msk.f32.gmra.mxu1 %vm570_vm1, %v512_v23 }
  0xfa   :  { %v351_v24 = vpop.f32.mrf.mxu0 }
  0xfb   :  { %v352_v26 = vadd.f32 %v1846_v22, %v351_v24 }
  0xfd   :  { %v513_v27 = vmax.f32 %v352_v26, 0.0  ;;  %1544 = vmatmul.msk.f32.gmra.mxu0 %vm96_vm0, %v57_v25 }
  0xff   :  { %1592 = vmatmul.msk.f32.gmra.mxu1 %vm570_vm1, %v513_v27  ;;  %v66_v27 = vld [vmem:[%s2599_s0 + $0x140] sm:$0xff] }
 0x102   :  { %v354_v29 = vpop.f32.mrf.mxu0 }
 0x103   :  { %v355_v31 = vadd.f32 %v1846_v22, %v354_v29 }
 0x104   :  { %v780_v32 = vpop.f32.mrf.mxu1 }
 0x105   :  { %v514_v33 = vmax.f32 %v355_v31, 0.0  ;;  %v781_v34 = vadd.f32 %v1971_v28, %v780_v32  ;;  %1545 = vmatmul.msk.f32.gmra.mxu0 %vm96_vm0, %v58_v30 }
 0x107   :  { %v972_v35 = vmax.f32 %v781_v34, 0.0  ;;  %1593 = vmatmul.msk.f32.gmra.mxu1 %vm570_vm1, %v514_v33 }
 0x109   :  { %1641 = vmatmul.msk.f32.vlgmr.msra.gmra.mxu2 %vm570_vm1, %v972_v35  ;;  %v67_v35 = vld [vmem:[%s2599_s0 + $0x148] sm:$0xff] }
 0x10a   :  { %v357_v36 = vpop.f32.mrf.mxu0 }
 0x10b   :  { %v358_v38 = vadd.f32 %v1846_v22, %v357_v36 }
 0x10c   :  { %v783_v39 = vpop.f32.mrf.mxu1 }
 0x10d   :  { %v515_v40 = vmax.f32 %v358_v38, 0.0  ;;  %v784_v41 = vadd.f32 %v1971_v28, %v783_v39  ;;  %1546 = vmatmul.msk.f32.gmra.mxu0 %vm96_vm0, %v59_v37 }
 0x10f   :  { %v973_v42 = vmax.f32 %v784_v41, 0.0  ;;  %1594 = vmatmul.msk.f32.gmra.mxu1 %vm570_vm1, %v515_v40 }
 0x111   :  { %1642 = vmatmul.msk.f32.gmra.mxu2 %vm570_vm1, %v973_v42  ;;  %v68_v42 = vld [vmem:[%s2599_s0 + $0x150] sm:$0xff] }
 0x112   :  { %v360_v43 = vpop.f32.mrf.mxu0 }
 0x113   :  { %v361_v45 = vadd.f32 %v1846_v22, %v360_v43 }
 0x114   :  { %v786_v46 = vpop.f32.mrf.mxu1 }
 0x115   :  { %v516_v47 = vmax.f32 %v361_v45, 0.0  ;;  %v787_v48 = vadd.f32 %v1971_v28, %v786_v46  ;;  %1547 = vmatmul.msk.f32.gmra.mxu0 %vm96_vm0, %v60_v44 }
 0x117   :  { %v974_v49 = vmax.f32 %v787_v48, 0.0  ;;  %1595 = vmatmul.msk.f32.gmra.mxu1 %vm570_vm1, %v516_v47 }
 0x119   :  { %1643 = vmatmul.msk.f32.gmra.mxu2 %vm570_vm1, %v974_v49  ;;  %v69_v49 = vld [vmem:[%s2599_s0 + $0x158] sm:$0xff] }
 0x11a   :  { %v363_v50 = vpop.f32.mrf.mxu0 }
 0x11b   :  { %v364_v52 = vadd.f32 %v1846_v22, %v363_v50 }
 0x11c   :  { %v789_v53 = vpop.f32.mrf.mxu1 }
 0x11d   :  { %v517_v54 = vmax.f32 %v364_v52, 0.0  ;;  %v790_v55 = vadd.f32 %v1971_v28, %v789_v53  ;;  %1548 = vmatmul.msk.f32.gmra.mxu0 %vm96_vm0, %v61_v51 }
 0x11f   :  { %v975_v56 = vmax.f32 %v790_v55, 0.0  ;;  %1596 = vmatmul.msk.f32.gmra.mxu1 %vm570_vm1, %v517_v54 }
 0x121   :  { %1644 = vmatmul.msk.f32.gmra.mxu2 %vm570_vm1, %v975_v56  ;;  %v70_v56 = vld [vmem:[%s2599_s0 + $0x160] sm:$0xff] }
 0x122   :  { %v366_v57 = vpop.f32.mrf.mxu0 }
 0x123   :  { %v367_v59 = vadd.f32 %v1846_v22, %v366_v57 }
 0x124   :  { %v792_v60 = vpop.f32.mrf.mxu1 }
 0x125   :  { %v518_v61 = vmax.f32 %v367_v59, 0.0  ;;  %v793_v62 = vadd.f32 %v1971_v28, %v792_v60  ;;  %1549 = vmatmul.msk.f32.gmra.mxu0 %vm96_vm0, %v62_v58 }
 0x127   :  { %v976_v63 = vmax.f32 %v793_v62, 0.0  ;;  %1597 = vmatmul.msk.f32.gmra.mxu1 %vm570_vm1, %v518_v61  ;;  %v75_v61 = vld [vmem:[%s2599_s0 + $0x188] sm:$0xff] }
 0x128   :  { %1562 = vmatmul.msk.f32.vlgmr.msra.gmra.mxu3 %vm96_vm0, %v75_v61 }
 0x129   :  { %1645 = vmatmul.msk.f32.gmra.mxu2 %vm570_vm1, %v976_v63  ;;  %1711 = vmatpush.msra.mxu3 %v1923_v7  ;;  %v76_v7 = vld [vmem:[%s2599_s0 + $0x190] sm:$0xff] }
 0x12a   :  { %v369_v0 = vpop.f32.mrf.mxu0 }
 0x12b   :  { %v370_v2 = vadd.f32 %v1846_v22, %v369_v0  ;;  %v71_v0 = vld [vmem:[%s2599_s0 + $0x168] sm:$0xff]  ;;  %1712 = vmatpush.msra.mxu3 %v1933_v11 }
 0x12c   :  { %v795_v3 = vpop.f32.mrf.mxu1 }
 0x12d   :  { %v519_v4 = vmax.f32 %v370_v2, 0.0  ;;  %v796_v5 = vadd.f32 %v1971_v28, %v795_v3  ;;  %1550 = vmatmul.msk.f32.gmra.mxu0 %vm96_vm0, %v63_v1  ;;  %1713 = vmatpush.msra.mxu3 %v1940_v13  ;;  %v72_v13 = vld [vmem:[%s2599_s0 + $0x170] sm:$0xff] }
 0x12f   :  { %v977_v6 = vmax.f32 %v796_v5, 0.0  ;;  %1598 = vmatmul.msk.f32.gmra.mxu1 %vm570_vm1, %v519_v4  ;;  %1714 = vmatpush.msra.mxu3 %v1947_v14  ;;  %v77_v14 = vld [vmem:[%s2599_s0 + $0x198] sm:$0xff] }
 0x130   :  { %1563 = vmatmul.msk.f32.gmra.mxu3 %vm96_vm0, %v76_v7 }
 0x131   :  { %1646 = vmatmul.msk.f32.gmra.mxu2 %vm570_vm1, %v977_v6 }
 0x132   :  { %v372_v8 = vpop.f32.mrf.mxu0 }
 0x133   :  { %v373_v10 = vadd.f32 %v1846_v22, %v372_v8 }
 0x134   :  { %v798_v12 = vpop.f32.mrf.mxu1 }
 0x135   :  { %v520_v15 = vmax.f32 %v373_v10, 0.0  ;;  %v799_v16 = vadd.f32 %v1971_v28, %v798_v12  ;;  %1551 = vmatmul.msk.f32.gmra.mxu0 %vm96_vm0, %v64_v9 }
 0x137   :  { %v978_v17 = vmax.f32 %v799_v16, 0.0  ;;  %1599 = vmatmul.msk.f32.gmra.mxu1 %vm570_vm1, %v520_v15  ;;  %v73_v16 = vld [vmem:[%s2599_s0 + $0x178] sm:$0xff] }
 0x138   :  { %1564 = vmatmul.msk.f32.gmra.mxu3 %vm96_vm0, %v77_v14  ;;  %v84_v14 = vld [vmem:[%s2599_s0 + $0x1d0] sm:$0xff] }
 0x139   :  { %1647 = vmatmul.msk.f32.gmra.mxu2 %vm570_vm1, %v978_v17 }
 0x13a   :  { %v375_v18 = vpop.f32.mrf.mxu0 }
 0x13b   :  { %v376_v20 = vadd.f32 %v1846_v22, %v375_v18 }
 0x13c   :  { %v801_v21 = vpop.f32.mrf.mxu1 }
 0x13d   :  { %v521_v23 = vmax.f32 %v376_v20, 0.0  ;;  %v802_v24 = vadd.f32 %v1971_v28, %v801_v21  ;;  %1552 = vmatmul.msk.f32.gmra.mxu0 %vm96_vm0, %v65_v19  ;;  %v78_v21 = vld [vmem:[%s2599_s0 + $0x1a0] sm:$0xff] }
 0x13f   :  { %v979_v25 = vmax.f32 %v802_v24, 0.0  ;;  %1600 = vmatmul.msk.f32.gmra.mxu1 %vm570_vm1, %v521_v23 }
 0x140   :  { %1565 = vmatmul.msk.f32.gmra.mxu3 %vm96_vm0, %v78_v21 }
 0x141   :  { %1648 = vmatmul.msk.f32.gmra.mxu2 %vm570_vm1, %v979_v25  ;;  %v74_v25 = vld [vmem:[%s2599_s0 + $0x180] sm:$0xff] }
 0x142   :  { %v378_v26 = vpop.f32.mrf.mxu0 }
 0x143   :  { %v379_v29 = vadd.f32 %v1846_v22, %v378_v26 }
 0x144   :  { %v804_v30 = vpop.f32.mrf.mxu1 }
 0x145   :  { %v522_v31 = vmax.f32 %v379_v29, 0.0  ;;  %v805_v32 = vadd.f32 %v1971_v28, %v804_v30  ;;  %1553 = vmatmul.msk.f32.gmra.mxu0 %vm96_vm0, %v66_v27 }
 0x147   :  { %v980_v33 = vmax.f32 %v805_v32, 0.0  ;;  %1601 = vmatmul.msk.f32.gmra.mxu1 %vm570_vm1, %v522_v31  ;;  %v79_v31 = vld [vmem:[%s2599_s0 + $0x1a8] sm:$0xff] }
 0x148   :  { %1566 = vmatmul.msk.f32.gmra.mxu3 %vm96_vm0, %v79_v31 }
 0x149   :  { %1649 = vmatmul.msk.f32.gmra.mxu2 %vm570_vm1, %v980_v33  ;;  %v2136_v33 = vld [vmem:[%s2604_s6] ss:$0 sm:$0xff] }
 0x14a   :  { %v381_v34 = vpop.f32.mrf.mxu0 }
 0x14b   :  { %v382_v36 = vadd.f32 %v1846_v22, %v381_v34 }
 0x14c   :  { %v807_v37 = vpop.f32.mrf.mxu1 }
 0x14d   :  { %v523_v38 = vmax.f32 %v382_v36, 0.0  ;;  %v808_v39 = vadd.f32 %v1971_v28, %v807_v37  ;;  %1554 = vmatmul.msk.f32.gmra.mxu0 %vm96_vm0, %v67_v35 }
 0x14f   :  { %v981_v40 = vmax.f32 %v808_v39, 0.0  ;;  %1602 = vmatmul.msk.f32.gmra.mxu1 %vm570_vm1, %v523_v38 }
 0x151   :  { %1650 = vmatmul.msk.f32.gmra.mxu2 %vm570_vm1, %v981_v40 }
 0x152   :  { %v384_v41 = vpop.f32.mrf.mxu0 }
 0x153   :  { %v385_v43 = vadd.f32 %v1846_v22, %v384_v41  ;;  %v80_v41 = vld [vmem:[%s2599_s0 + $0x1b0] sm:$0xff] }
 0x154   :  { %v810_v44 = vpop.f32.mrf.mxu1  ;;  %1567 = vmatmul.msk.f32.gmra.mxu3 %vm96_vm0, %v80_v41 }
 0x155   :  { %v524_v45 = vmax.f32 %v385_v43, 0.0  ;;  %v811_v46 = vadd.f32 %v1971_v28, %v810_v44  ;;  %1555 = vmatmul.msk.f32.gmra.mxu0 %vm96_vm0, %v68_v42 }
 0x157   :  { %v982_v47 = vmax.f32 %v811_v46, 0.0  ;;  %1603 = vmatmul.msk.f32.gmra.mxu1 %vm570_vm1, %v524_v45 }
 0x159   :  { %1651 = vmatmul.msk.f32.gmra.mxu2 %vm570_vm1, %v982_v47 }
 0x15a   :  { %v387_v48 = vpop.f32.mrf.mxu0 }
 0x15b   :  { %v388_v50 = vadd.f32 %v1846_v22, %v387_v48 }
 0x15c   :  { %v813_v51 = vpop.f32.mrf.mxu1 }
 0x15d   :  { %v525_v52 = vmax.f32 %v388_v50, 0.0  ;;  %v814_v53 = vadd.f32 %v1971_v28, %v813_v51  ;;  %1556 = vmatmul.msk.f32.gmra.mxu0 %vm96_vm0, %v69_v49  ;;  %v81_v50 = vld [vmem:[%s2599_s0 + $0x1b8] sm:$0xff] }
 0x15e   :  { %1568 = vmatmul.msk.f32.gmra.mxu3 %vm96_vm0, %v81_v50 }
 0x15f   :  { %v983_v54 = vmax.f32 %v814_v53, 0.0  ;;  %1604 = vmatmul.msk.f32.gmra.mxu1 %vm570_vm1, %v525_v52 }
 0x161   :  { %1652 = vmatmul.msk.f32.gmra.mxu2 %vm570_vm1, %v983_v54 }
 0x162   :  { %v390_v55 = vpop.f32.mrf.mxu0 }
 0x163   :  { %v391_v57 = vadd.f32 %v1846_v22, %v390_v55 }
 0x164   :  { %v816_v58 = vpop.f32.mrf.mxu1 }
 0x165   :  { %v526_v59 = vmax.f32 %v391_v57, 0.0  ;;  %v817_v60 = vadd.f32 %v1971_v28, %v816_v58  ;;  %1557 = vmatmul.msk.f32.gmra.mxu0 %vm96_vm0, %v70_v56 }
 0x167   :  { %v984_v62 = vmax.f32 %v817_v60, 0.0  ;;  %1605 = vmatmul.msk.f32.gmra.mxu1 %vm570_vm1, %v526_v59  ;;  %v82_v59 = vld [vmem:[%s2599_s0 + $0x1c0] sm:$0xff] }
 0x168   :  { %1569 = vmatmul.msk.f32.gmra.mxu3 %vm96_vm0, %v82_v59 }
 0x169   :  { %1653 = vmatmul.msk.f32.gmra.mxu2 %vm570_vm1, %v984_v62 }
 0x16a   :  { %v393_v63 = vpop.f32.mrf.mxu0 }
 0x16b   :  { %v394_v1 = vadd.f32 %v1846_v22, %v393_v63 }
 0x16c   :  { %v819_v2 = vpop.f32.mrf.mxu1 }
 0x16d   :  { %v527_v3 = vmax.f32 %v394_v1, 0.0  ;;  %v820_v4 = vadd.f32 %v1971_v28, %v819_v2  ;;  %1558 = vmatmul.msk.f32.gmra.mxu0 %vm96_vm0, %v71_v0 }
 0x16f   :  { %v985_v5 = vmax.f32 %v820_v4, 0.0  ;;  %1606 = vmatmul.msk.f32.gmra.mxu1 %vm570_vm1, %v527_v3  ;;  %v83_v4 = vld [vmem:[%s2599_s0 + $0x1c8] sm:$0xff] }
 0x170   :  { %1570 = vmatmul.msk.f32.gmra.mxu3 %vm96_vm0, %v83_v4 }
 0x171   :  { %1654 = vmatmul.msk.f32.gmra.mxu2 %vm570_vm1, %v985_v5 }
 0x172   :  { %v396_v11 = vpop.f32.mrf.mxu0 }
 0x173   :  { %v397_v6 = vadd.f32 %v1846_v22, %v396_v11 }
 0x174   :  { %v822_v8 = vpop.f32.mrf.mxu1 }
 0x175   :  { %v528_v9 = vmax.f32 %v397_v6, 0.0  ;;  %v823_v10 = vadd.f32 %v1971_v28, %v822_v8  ;;  %1559 = vmatmul.msk.f32.gmra.mxu0 %vm96_vm0, %v72_v13 }
 0x177   :  { %v986_v12 = vmax.f32 %v823_v10, 0.0  ;;  %1607 = vmatmul.msk.f32.gmra.mxu1 %vm570_vm1, %v528_v9 }
 0x178   :  { %1571 = vmatmul.msk.f32.gmra.mxu3 %vm96_vm0, %v84_v14 }
 0x179   :  { %1655 = vmatmul.msk.f32.gmra.mxu2 %vm570_vm1, %v986_v12 }
 0x17a   :  { %v399_v15 = vpop.f32.mrf.mxu0 }
 0x17b   :  { %v400_v17 = vadd.f32 %v1846_v22, %v399_v15 }
 0x17c   :  { %v825_v18 = vpop.f32.mrf.mxu1 }
 0x17d   :  { %v529_v19 = vmax.f32 %v400_v17, 0.0  ;;  %v826_v20 = vadd.f32 %v1971_v28, %v825_v18  ;;  %1560 = vmatmul.msk.f32.gmra.mxu0 %vm96_vm0, %v73_v16 }
 0x17f   :  { %v987_v23 = vmax.f32 %v826_v20, 0.0  ;;  %1608 = vmatmul.msk.f32.gmra.mxu1 %vm570_vm1, %v529_v19 }
 0x181   :  { %1656 = vmatmul.msk.f32.gmra.mxu2 %vm570_vm1, %v987_v23  ;;  %v85_v23 = vld [vmem:[%s2599_s0 + $0x1d8] sm:$0xff] }
 0x182   :  { %v402_v24 = vpop.f32.mrf.mxu0  ;;  %1572 = vmatmul.msk.f32.gmra.mxu3 %vm96_vm0, %v85_v23 }
 0x183   :  { %v403_v26 = vadd.f32 %v1846_v22, %v402_v24 }
 0x184   :  { %v828_v27 = vpop.f32.mrf.mxu1 }
 0x185   :  { %v530_v29 = vmax.f32 %v403_v26, 0.0  ;;  %v829_v30 = vadd.f32 %v1971_v28, %v828_v27  ;;  %1561 = vmatmul.msk.f32.gmra.mxu0 %vm96_vm0, %v74_v25 }
 0x187   :  { %v988_v32 = vmax.f32 %v829_v30, 0.0  ;;  %1609 = vmatmul.msk.f32.gmra.mxu1 %vm570_vm1, %v530_v29 }
 0x189   :  { %1657 = vmatmul.msk.f32.gmra.mxu2 %vm570_vm1, %v988_v32 }
 0x18a   :  { %v405_v34 = vpop.f32.mrf.mxu0 }
 0x18b   :  { %v406_v35 = vadd.f32 %v1846_v22, %v405_v34  ;;  %v86_v34 = vld [vmem:[%s2599_s0 + $0x1e0] sm:$0xff] }
 0x18c   :  { %v831_v36 = vpop.f32.mrf.mxu1  ;;  %v1253_v37 = vpop.f32.mrf.mxu2  ;;  %1573 = vmatmul.msk.f32.gmra.mxu3 %vm96_vm0, %v86_v34 }
 0x18d   :  { %v531_v38 = vmax.f32 %v406_v35, 0.0  ;;  %v832_v39 = vadd.f32 %v1971_v28, %v831_v36  ;;  %v1254_v40 = vadd.f32 %v2136_v33, %v1253_v37 }
 0x18f   :  { %v989_v42 = vmax.f32 %v832_v39, 0.0  ;;  %1445 = vst [vmem:[%s2605_s7] sm:$0xff] %v1254_v40  ;;  %1610 = vmatmul.msk.f32.gmra.mxu1 %vm570_vm1, %v531_v38 }
 0x191   :  { %1658 = vmatmul.msk.f32.gmra.mxu2 %vm570_vm1, %v989_v42 }
 0x192   :  { %v408_v43 = vpop.f32.mrf.mxu0 }
 0x193   :  { %v409_v44 = vadd.f32 %v1846_v22, %v408_v43  ;;  %v87_v43 = vld [vmem:[%s2599_s0 + $0x1e8] sm:$0xff] }
 0x194   :  { %v834_v45 = vpop.f32.mrf.mxu1  ;;  %v1256_v46 = vpop.f32.mrf.mxu2  ;;  %1574 = vmatmul.msk.f32.gmra.mxu3 %vm96_vm0, %v87_v43 }
 0x195   :  { %v532_v47 = vmax.f32 %v409_v44, 0.0  ;;  %v835_v48 = vadd.f32 %v1971_v28, %v834_v45  ;;  %v1257_v49 = vadd.f32 %v2136_v33, %v1256_v46 }
 0x197   :  { %v990_v51 = vmax.f32 %v835_v48, 0.0  ;;  %1446 = vst [vmem:[%s2605_s7 + $0x8] sm:$0xff] %v1257_v49  ;;  %1611 = vmatmul.msk.f32.gmra.mxu1 %vm570_vm1, %v532_v47 }
 0x199   :  { %1659 = vmatmul.msk.f32.gmra.mxu2 %vm570_vm1, %v990_v51 }
 0x19a   :  { %v411_v52 = vpop.f32.mrf.mxu0 }
 0x19b   :  { %v412_v53 = vadd.f32 %v1846_v22, %v411_v52  ;;  %v88_v52 = vld [vmem:[%s2599_s0 + $0x1f0] sm:$0xff] }
 0x19c   :  { %v837_v54 = vpop.f32.mrf.mxu1  ;;  %v1259_v55 = vpop.f32.mrf.mxu2  ;;  %1575 = vmatmul.msk.f32.gmra.mxu3 %vm96_vm0, %v88_v52 }
 0x19d   :  { %v533_v56 = vmax.f32 %v412_v53, 0.0  ;;  %v838_v57 = vadd.f32 %v1971_v28, %v837_v54  ;;  %v1260_v58 = vadd.f32 %v2136_v33, %v1259_v55 }
 0x19f   :  { %v991_v60 = vmax.f32 %v838_v57, 0.0  ;;  %1447 = vst [vmem:[%s2605_s7 + $0x10] sm:$0xff] %v1260_v58  ;;  %1612 = vmatmul.msk.f32.gmra.mxu1 %vm570_vm1, %v533_v56 }
 0x1a1   :  { %1660 = vmatmul.msk.f32.gmra.mxu2 %vm570_vm1, %v991_v60 }
 0x1a2   :  { %v414_v61 = vpop.f32.mrf.mxu0 }
 0x1a3   :  { %v415_v62 = vadd.f32 %v1846_v22, %v414_v61  ;;  %v89_v61 = vld [vmem:[%s2599_s0 + $0x1f8] sm:$0xff] }
 0x1a4   :  { %v840_v63 = vpop.f32.mrf.mxu1  ;;  %v1262_v0 = vpop.f32.mrf.mxu2  ;;  %1576 = vmatmul.msk.f32.gmra.mxu3 %vm96_vm0, %v89_v61 }
 0x1a5   :  { %v534_v1 = vmax.f32 %v415_v62, 0.0  ;;  %v841_v2 = vadd.f32 %v1971_v28, %v840_v63  ;;  %v1263_v3 = vadd.f32 %v2136_v33, %v1262_v0 }
 0x1a7   :  { %v992_v7 = vmax.f32 %v841_v2, 0.0  ;;  %1448 = vst [vmem:[%s2605_s7 + $0x18] sm:$0xff] %v1263_v3  ;;  %1613 = vmatmul.msk.f32.gmra.mxu1 %vm570_vm1, %v534_v1 }
 0x1a9   :  { %1661 = vmatmul.msk.f32.gmra.mxu2 %vm570_vm1, %v992_v7 }
 0x1aa   :  { %v417_v5 = vpop.f32.mrf.mxu0 }
 0x1ab   :  { %v418_v11 = vadd.f32 %v1846_v22, %v417_v5 }
 0x1ac   :  { %v843_v13 = vpop.f32.mrf.mxu1  ;;  %v1265_v6 = vpop.f32.mrf.mxu2 }
 0x1ad   :  { %v535_v8 = vmax.f32 %v418_v11, 0.0  ;;  %v844_v9 = vadd.f32 %v1971_v28, %v843_v13  ;;  %v1266_v10 = vadd.f32 %v2136_v33, %v1265_v6 }
 0x1af   :  { %v993_v12 = vmax.f32 %v844_v9, 0.0  ;;  %1449 = vst [vmem:[%s2605_s7 + $0x20] sm:$0xff] %v1266_v10  ;;  %1614 = vmatmul.msk.f32.gmra.mxu1 %vm570_vm1, %v535_v8 }
 0x1b1   :  { %1662 = vmatmul.msk.f32.gmra.mxu2 %vm570_vm1, %v993_v12 }
 0x1b2   :  { %v420_v15 = vpop.f32.mrf.mxu0 }
 0x1b3   :  { %v421_v16 = vadd.f32 %v1846_v22, %v420_v15 }
 0x1b4   :  { %v846_v17 = vpop.f32.mrf.mxu1  ;;  %v1268_v18 = vpop.f32.mrf.mxu2 }
 0x1b5   :  { %v536_v19 = vmax.f32 %v421_v16, 0.0  ;;  %v847_v20 = vadd.f32 %v1971_v28, %v846_v17  ;;  %v1269_v21 = vadd.f32 %v2136_v33, %v1268_v18  ;;  %v453_v16 = vpop.f32.mrf.mxu3 }
 0x1b7   :  { %v994_v24 = vmax.f32 %v847_v20, 0.0  ;;  %1450 = vst [vmem:[%s2605_s7 + $0x28] sm:$0xff] %v1269_v21  ;;  %1615 = vmatmul.msk.f32.gmra.mxu1 %vm570_vm1, %v536_v19 }
 0x1b9   :  { %1663 = vmatmul.msk.f32.gmra.mxu2 %vm570_vm1, %v994_v24 }
 0x1ba   :  { %v423_v25 = vpop.f32.mrf.mxu0 }
 0x1bb   :  { %v424_v26 = vadd.f32 %v1846_v22, %v423_v25 }
 0x1bc   :  { %v849_v27 = vpop.f32.mrf.mxu1  ;;  %v1271_v29 = vpop.f32.mrf.mxu2 }
 0x1bd   :  { %v537_v30 = vmax.f32 %v424_v26, 0.0  ;;  %v850_v31 = vadd.f32 %v1971_v28, %v849_v27  ;;  %v1272_v32 = vadd.f32 %v2136_v33, %v1271_v29  ;;  %v456_v26 = vpop.f32.mrf.mxu3 }
 0x1be   :  { %v457_v61 = vadd.f32 %v1846_v22, %v456_v26 }
 0x1bf   :  { %v995_v35 = vmax.f32 %v850_v31, 0.0  ;;  %1451 = vst [vmem:[%s2605_s7 + $0x30] sm:$0xff] %v1272_v32  ;;  %1616 = vmatmul.msk.f32.gmra.mxu1 %vm570_vm1, %v537_v30 }
 0x1c1   :  { %1664 = vmatmul.msk.f32.gmra.mxu2 %vm570_vm1, %v995_v35 }
 0x1c2   :  { %v426_v36 = vpop.f32.mrf.mxu0 }
 0x1c3   :  { %v427_v37 = vadd.f32 %v1846_v22, %v426_v36 }
 0x1c4   :  { %v852_v38 = vpop.f32.mrf.mxu1  ;;  %v1274_v39 = vpop.f32.mrf.mxu2 }
 0x1c5   :  { %v538_v40 = vmax.f32 %v427_v37, 0.0  ;;  %v853_v41 = vadd.f32 %v1971_v28, %v852_v38  ;;  %v1275_v42 = vadd.f32 %v2136_v33, %v1274_v39  ;;  %v459_v38 = vpop.f32.mrf.mxu3 }
 0x1c7   :  { %v996_v44 = vmax.f32 %v853_v41, 0.0  ;;  %1452 = vst [vmem:[%s2605_s7 + $0x38] sm:$0xff] %v1275_v42  ;;  %1617 = vmatmul.msk.f32.gmra.mxu1 %vm570_vm1, %v538_v40 }
 0x1c9   :  { %1665 = vmatmul.msk.f32.gmra.mxu2 %vm570_vm1, %v996_v44 }
 0x1ca   :  { %v429_v45 = vpop.f32.mrf.mxu0 }
 0x1cb   :  { %v430_v46 = vadd.f32 %v1846_v22, %v429_v45 }
 0x1cc   :  { %v855_v47 = vpop.f32.mrf.mxu1  ;;  %v1277_v48 = vpop.f32.mrf.mxu2 }
 0x1cd   :  { %v539_v49 = vmax.f32 %v430_v46, 0.0  ;;  %v856_v50 = vadd.f32 %v1971_v28, %v855_v47  ;;  %v1278_v51 = vadd.f32 %v2136_v33, %v1277_v48  ;;  %v462_v52 = vpop.f32.mrf.mxu3 }
 0x1cf   :  { %v997_v53 = vmax.f32 %v856_v50, 0.0  ;;  %1453 = vst [vmem:[%s2605_s7 + $0x40] sm:$0xff] %v1278_v51  ;;  %1618 = vmatmul.msk.f32.gmra.mxu1 %vm570_vm1, %v539_v49 }
 0x1d1   :  { %1666 = vmatmul.msk.f32.gmra.mxu2 %vm570_vm1, %v997_v53 }
 0x1d2   :  { %v432_v54 = vpop.f32.mrf.mxu0 }
 0x1d3   :  { %v433_v55 = vadd.f32 %v1846_v22, %v432_v54  ;;  %v454_v54 = vadd.f32 %v1846_v22, %v453_v16 }
 0x1d4   :  { %v858_v56 = vpop.f32.mrf.mxu1  ;;  %v1280_v57 = vpop.f32.mrf.mxu2 }
 0x1d5   :  { %v540_v58 = vmax.f32 %v433_v55, 0.0  ;;  %v859_v59 = vadd.f32 %v1971_v28, %v858_v56  ;;  %v1281_v60 = vadd.f32 %v2136_v33, %v1280_v57  ;;  %v547_v55 = vmax.f32 %v454_v54, 0.0 }
 0x1d7   :  { %v998_v62 = vmax.f32 %v859_v59, 0.0  ;;  %1454 = vst [vmem:[%s2605_s7 + $0x48] sm:$0xff] %v1281_v60  ;;  %1619 = vmatmul.msk.f32.gmra.mxu1 %vm570_vm1, %v540_v58 }
 0x1d9   :  { %1667 = vmatmul.msk.f32.gmra.mxu2 %vm570_vm1, %v998_v62  ;;  %v465_v62 = vpop.f32.mrf.mxu3 }
 0x1da   :  { %v435_v63 = vpop.f32.mrf.mxu0 }
 0x1db   :  { %v436_v0 = vadd.f32 %v1846_v22, %v435_v63  ;;  %v548_v63 = vmax.f32 %v457_v61, 0.0 }
 0x1dc   :  { %v861_v1 = vpop.f32.mrf.mxu1  ;;  %v1283_v2 = vpop.f32.mrf.mxu2 }
 0x1dd   :  { %v541_v3 = vmax.f32 %v436_v0, 0.0  ;;  %v862_v4 = vadd.f32 %v1971_v28, %v861_v1  ;;  %v1284_v7 = vadd.f32 %v2136_v33, %v1283_v2 }
 0x1df   :  { %v999_v5 = vmax.f32 %v862_v4, 0.0  ;;  %1455 = vst [vmem:[%s2605_s7 + $0x50] sm:$0xff] %v1284_v7  ;;  %1620 = vmatmul.msk.f32.gmra.mxu1 %vm570_vm1, %v541_v3 }
 0x1e1   :  { %1668 = vmatmul.msk.f32.gmra.mxu2 %vm570_vm1, %v999_v5  ;;  %v468_v5 = vpop.f32.mrf.mxu3 }
 0x1e2   :  { %v438_v11 = vpop.f32.mrf.mxu0 }
 0x1e3   :  { %v439_v13 = vadd.f32 %v1846_v22, %v438_v11 }
 0x1e4   :  { %v864_v6 = vpop.f32.mrf.mxu1  ;;  %v1286_v8 = vpop.f32.mrf.mxu2 }
 0x1e5   :  { %v542_v9 = vmax.f32 %v439_v13, 0.0  ;;  %v865_v10 = vadd.f32 %v1971_v28, %v864_v6  ;;  %v1287_v14 = vadd.f32 %v2136_v33, %v1286_v8 }
 0x1e7   :  { %v1000_v12 = vmax.f32 %v865_v10, 0.0  ;;  %1456 = vst [vmem:[%s2605_s7 + $0x58] sm:$0xff] %v1287_v14  ;;  %1621 = vmatmul.msk.f32.gmra.mxu1 %vm570_vm1, %v542_v9 }
 0x1e9   :  { %1669 = vmatmul.msk.f32.gmra.mxu2 %vm570_vm1, %v1000_v12 }
 0x1ea   :  { %v441_v15 = vpop.f32.mrf.mxu0 }
 0x1eb   :  { %v442_v17 = vadd.f32 %v1846_v22, %v441_v15  ;;  %v471_v15 = vpop.f32.mrf.mxu3 }
 0x1ec   :  { %v867_v18 = vpop.f32.mrf.mxu1  ;;  %v1289_v19 = vpop.f32.mrf.mxu2 }
 0x1ed   :  { %v543_v20 = vmax.f32 %v442_v17, 0.0  ;;  %v868_v21 = vadd.f32 %v1971_v28, %v867_v18  ;;  %v1290_v23 = vadd.f32 %v2136_v33, %v1289_v19 }
 0x1ef   :  { %v1001_v24 = vmax.f32 %v868_v21, 0.0  ;;  %1457 = vst [vmem:[%s2605_s7 + $0x60] sm:$0xff] %v1290_v23  ;;  %1622 = vmatmul.msk.f32.gmra.mxu1 %vm570_vm1, %v543_v20 }
 0x1f1   :  { %1670 = vmatmul.msk.f32.gmra.mxu2 %vm570_vm1, %v1001_v24 }
 0x1f2   :  { %v444_v25 = vpop.f32.mrf.mxu0 }
 0x1f3   :  { %v445_v27 = vadd.f32 %v1846_v22, %v444_v25 }
 0x1f4   :  { %v870_v29 = vpop.f32.mrf.mxu1  ;;  %v1292_v30 = vpop.f32.mrf.mxu2 }
 0x1f5   :  { %v544_v31 = vmax.f32 %v445_v27, 0.0  ;;  %v871_v32 = vadd.f32 %v1971_v28, %v870_v29  ;;  %v1293_v34 = vadd.f32 %v2136_v33, %v1292_v30  ;;  %v474_v29 = vpop.f32.mrf.mxu3 }
 0x1f7   :  { %v1002_v35 = vmax.f32 %v871_v32, 0.0  ;;  %1458 = vst [vmem:[%s2605_s7 + $0x68] sm:$0xff] %v1293_v34  ;;  %1623 = vmatmul.msk.f32.gmra.mxu1 %vm570_vm1, %v544_v31 }
 0x1f9   :  { %1671 = vmatmul.msk.f32.gmra.mxu2 %vm570_vm1, %v1002_v35 }
 0x1fa   :  { %v447_v36 = vpop.f32.mrf.mxu0 }
 0x1fb   :  { %v448_v37 = vadd.f32 %v1846_v22, %v447_v36 }
 0x1fc   :  { %v873_v39 = vpop.f32.mrf.mxu1  ;;  %v1295_v40 = vpop.f32.mrf.mxu2 }
 0x1fd   :  { %v545_v41 = vmax.f32 %v448_v37, 0.0  ;;  %v874_v42 = vadd.f32 %v1971_v28, %v873_v39  ;;  %v1296_v43 = vadd.f32 %v2136_v33, %v1295_v40  ;;  %v477_v40 = vpop.f32.mrf.mxu3 }
 0x1ff   :  { %v1003_v44 = vmax.f32 %v874_v42, 0.0  ;;  %1459 = vst [vmem:[%s2605_s7 + $0x70] sm:$0xff] %v1296_v43  ;;  %1624 = vmatmul.msk.f32.gmra.mxu1 %vm570_vm1, %v545_v41 }
 0x201   :  { %1672 = vmatmul.msk.f32.gmra.mxu2 %vm570_vm1, %v1003_v44 }
 0x202   :  { %v450_v45 = vpop.f32.mrf.mxu0 }
 0x203   :  { %v451_v46 = vadd.f32 %v1846_v22, %v450_v45  ;;  %v2324_v22 = vld [vmem:[%s2600_s2] ss:$0 sm:$0xff] }
 0x204   :  { %v876_v47 = vpop.f32.mrf.mxu1  ;;  %v1298_v48 = vpop.f32.mrf.mxu2  ;;  %v460_v7 = vadd.f32 %v2324_v22, %v459_v38  ;;  %v463_v14 = vadd.f32 %v2324_v22, %v462_v52  ;;  %v466_v21 = vadd.f32 %v2324_v22, %v465_v62  ;;  %v469_v31 = vadd.f32 %v2324_v22, %v468_v5 }
 0x205   :  { %v546_v49 = vmax.f32 %v451_v46, 0.0  ;;  %v877_v50 = vadd.f32 %v1971_v28, %v876_v47  ;;  %v1299_v51 = vadd.f32 %v2136_v33, %v1298_v48  ;;  %v472_v39 = vadd.f32 %v2324_v22, %v471_v15  ;;  %v480_v48 = vpop.f32.mrf.mxu3 }
 0x206   :  { %v549_v11 = vmax.f32 %v460_v7, 0.0  ;;  %v550_v12 = vmax.f32 %v463_v14, 0.0  ;;  %v551_v23 = vmax.f32 %v466_v21, 0.0  ;;  %v552_v32 = vmax.f32 %v469_v31, 0.0 }
 0x207   :  { %v1004_v53 = vmax.f32 %v877_v50, 0.0  ;;  %1460 = vst [vmem:[%s2605_s7 + $0x78] sm:$0xff] %v1299_v51  ;;  %1625 = vmatmul.msk.f32.vlgmr.msrb.gmra.mxu3 %vm570_vm1, %v546_v49  ;;  %v553_v41 = vmax.f32 %v472_v39, 0.0  ;;  %v475_v47 = vadd.f32 %v2324_v22, %v474_v29 }
 0x209   :  { %1673 = vmatmul.msk.f32.gmra.mxu2 %vm570_vm1, %v1004_v53  ;;  %v554_v49 = vmax.f32 %v475_v47, 0.0 }
 0x20c   :  { %v879_v56 = vpop.f32.mrf.mxu1  ;;  %v1301_v57 = vpop.f32.mrf.mxu2 }
 0x20d   :  { %v880_v58 = vadd.f32 %v1971_v28, %v879_v56  ;;  %v1302_v59 = vadd.f32 %v2136_v33, %v1301_v57  ;;  %v483_v57 = vpop.f32.mrf.mxu3 }
 0x20f   :  { %v1005_v60 = vmax.f32 %v880_v58, 0.0  ;;  %1461 = vst [vmem:[%s2605_s7 + $0x80] sm:$0xff] %v1302_v59  ;;  %1626 = vmatmul.msk.f32.gmra.mxu3 %vm570_vm1, %v547_v55  ;;  %v478_v55 = vadd.f32 %v2324_v22, %v477_v40 }
 0x211   :  { %1674 = vmatmul.msk.f32.gmra.mxu2 %vm570_vm1, %v1005_v60  ;;  %v555_v56 = vmax.f32 %v478_v55, 0.0 }
 0x214   :  { %v882_v0 = vpop.f32.mrf.mxu1  ;;  %v1304_v1 = vpop.f32.mrf.mxu2 }
 0x215   :  { %v883_v2 = vadd.f32 %v1971_v28, %v882_v0  ;;  %v1305_v3 = vadd.f32 %v2136_v33, %v1304_v1  ;;  %v486_v7 = vpop.f32.mrf.mxu3 }
 0x217   :  { %v1006_v4 = vmax.f32 %v883_v2, 0.0  ;;  %1462 = vst [vmem:[%s2605_s7 + $0x88] sm:$0xff] %v1305_v3  ;;  %1627 = vmatmul.msk.f32.gmra.mxu3 %vm570_vm1, %v548_v63  ;;  %v481_v63 = vadd.f32 %v2324_v22, %v480_v48 }
 0x219   :  { %1675 = vmatmul.msk.f32.gmra.mxu2 %vm570_vm1, %v1006_v4  ;;  %v556_v0 = vmax.f32 %v481_v63, 0.0 }
 0x21c   :  { %v885_v13 = vpop.f32.mrf.mxu1  ;;  %v1307_v6 = vpop.f32.mrf.mxu2 }
 0x21d   :  { %v886_v8 = vadd.f32 %v1971_v28, %v885_v13  ;;  %v1308_v9 = vadd.f32 %v2136_v33, %v1307_v6  ;;  %v489_v15 = vpop.f32.mrf.mxu3 }
 0x21f   :  { %v1007_v10 = vmax.f32 %v886_v8, 0.0  ;;  %1463 = vst [vmem:[%s2605_s7 + $0x90] sm:$0xff] %v1308_v9  ;;  %1628 = vmatmul.msk.f32.gmra.mxu3 %vm570_vm1, %v549_v11  ;;  %v484_v11 = vadd.f32 %v2324_v22, %v483_v57 }
 0x221   :  { %1676 = vmatmul.msk.f32.gmra.mxu2 %vm570_vm1, %v1007_v10  ;;  %v557_v13 = vmax.f32 %v484_v11, 0.0 }
 0x224   :  { %v888_v16 = vpop.f32.mrf.mxu1  ;;  %v1310_v17 = vpop.f32.mrf.mxu2 }
 0x225   :  { %v889_v18 = vadd.f32 %v1971_v28, %v888_v16  ;;  %v1311_v19 = vadd.f32 %v2136_v33, %v1310_v17 }
 0x227   :  { %v1008_v20 = vmax.f32 %v889_v18, 0.0  ;;  %1464 = vst [vmem:[%s2605_s7 + $0x98] sm:$0xff] %v1311_v19  ;;  %1629 = vmatmul.msk.f32.gmra.mxu3 %vm570_vm1, %v550_v12  ;;  %v487_v12 = vadd.f32 %v2324_v22, %v486_v7 }
 0x229   :  { %1677 = vmatmul.msk.f32.gmra.mxu2 %vm570_vm1, %v1008_v20  ;;  %v558_v16 = vmax.f32 %v487_v12, 0.0 }
 0x22c   :  { %v891_v24 = vpop.f32.mrf.mxu1  ;;  %v1313_v25 = vpop.f32.mrf.mxu2 }
 0x22d   :  { %v892_v26 = vadd.f32 %v1971_v28, %v891_v24  ;;  %v1314_v27 = vadd.f32 %v2136_v33, %v1313_v25  ;;  %v492_v24 = vpop.f32.mrf.mxu3 }
 0x22f   :  { %v1009_v30 = vmax.f32 %v892_v26, 0.0  ;;  %1465 = vst [vmem:[%s2605_s7 + $0xa0] sm:$0xff] %v1314_v27  ;;  %1630 = vmatmul.msk.f32.gmra.mxu3 %vm570_vm1, %v551_v23  ;;  %v490_v23 = vadd.f32 %v2324_v22, %v489_v15 }
 0x231   :  { %1678 = vmatmul.msk.f32.gmra.mxu2 %vm570_vm1, %v1009_v30  ;;  %v559_v25 = vmax.f32 %v490_v23, 0.0 }
 0x234   :  { %v894_v34 = vpop.f32.mrf.mxu1  ;;  %v1316_v35 = vpop.f32.mrf.mxu2 }
 0x235   :  { %v895_v36 = vadd.f32 %v1971_v28, %v894_v34  ;;  %v1317_v37 = vadd.f32 %v2136_v33, %v1316_v35  ;;  %v495_v35 = vpop.f32.mrf.mxu3 }
 0x237   :  { %v1010_v38 = vmax.f32 %v895_v36, 0.0  ;;  %1466 = vst [vmem:[%s2605_s7 + $0xa8] sm:$0xff] %v1317_v37  ;;  %1631 = vmatmul.msk.f32.gmra.mxu3 %vm570_vm1, %v552_v32  ;;  %v493_v32 = vadd.f32 %v2324_v22, %v492_v24 }
 0x239   :  { %1679 = vmatmul.msk.f32.gmra.mxu2 %vm570_vm1, %v1010_v38  ;;  %v560_v34 = vmax.f32 %v493_v32, 0.0 }
 0x23c   :  { %v897_v42 = vpop.f32.mrf.mxu1  ;;  %v1319_v43 = vpop.f32.mrf.mxu2 }
 0x23d   :  { %v898_v44 = vadd.f32 %v1971_v28, %v897_v42  ;;  %v1320_v45 = vadd.f32 %v2136_v33, %v1319_v43 }
 0x23f   :  { %v1011_v46 = vmax.f32 %v898_v44, 0.0  ;;  %1467 = vst [vmem:[%s2605_s7 + $0xb0] sm:$0xff] %v1320_v45  ;;  %1632 = vmatmul.msk.f32.gmra.mxu3 %vm570_vm1, %v553_v41  ;;  %v496_v41 = vadd.f32 %v2324_v22, %v495_v35 }
 0x241   :  { %1680 = vmatmul.msk.f32.gmra.mxu2 %vm570_vm1, %v1011_v46  ;;  %v561_v42 = vmax.f32 %v496_v41, 0.0 }
 0x244   :  { %v900_v50 = vpop.f32.mrf.mxu1  ;;  %v1322_v51 = vpop.f32.mrf.mxu2 }
 0x245   :  { %v901_v52 = vadd.f32 %v1971_v28, %v900_v50  ;;  %v1323_v53 = vadd.f32 %v2136_v33, %v1322_v51 }
 0x247   :  { %v1012_v54 = vmax.f32 %v901_v52, 0.0  ;;  %1468 = vst [vmem:[%s2605_s7 + $0xb8] sm:$0xff] %v1323_v53  ;;  %1633 = vmatmul.msk.f32.gmra.mxu3 %vm570_vm1, %v554_v49 }
 0x249   :  { %1681 = vmatmul.msk.f32.gmra.mxu2 %vm570_vm1, %v1012_v54 }
 0x24c   :  { %v903_v58 = vpop.f32.mrf.mxu1  ;;  %v1325_v59 = vpop.f32.mrf.mxu2 }
 0x24d   :  { %v904_v60 = vadd.f32 %v1971_v28, %v903_v58  ;;  %v1326_v61 = vadd.f32 %v2136_v33, %v1325_v59 }
 0x24f   :  { %v1013_v62 = vmax.f32 %v904_v60, 0.0  ;;  %1469 = vst [vmem:[%s2605_s7 + $0xc0] sm:$0xff] %v1326_v61  ;;  %1634 = vmatmul.msk.f32.gmra.mxu3 %vm570_vm1, %v555_v56 }
 0x251   :  { %1682 = vmatmul.msk.f32.gmra.mxu2 %vm570_vm1, %v1013_v62 }
 0x254   :  { %v906_v1 = vpop.f32.mrf.mxu1  ;;  %v1328_v2 = vpop.f32.mrf.mxu2 }
 0x255   :  { %v907_v3 = vadd.f32 %v1971_v28, %v906_v1  ;;  %v1329_v4 = vadd.f32 %v2136_v33, %v1328_v2 }
 0x257   :  { %v1014_v5 = vmax.f32 %v907_v3, 0.0  ;;  %1470 = vst [vmem:[%s2605_s7 + $0xc8] sm:$0xff] %v1329_v4  ;;  %1635 = vmatmul.msk.f32.gmra.mxu3 %vm570_vm1, %v556_v0 }
 0x259   :  { %1683 = vmatmul.msk.f32.gmra.mxu2 %vm570_vm1, %v1014_v5 }
 0x25c   :  { %v909_v6 = vpop.f32.mrf.mxu1  ;;  %v1331_v8 = vpop.f32.mrf.mxu2 }
 0x25d   :  { %v910_v9 = vadd.f32 %v1971_v28, %v909_v6  ;;  %v1332_v10 = vadd.f32 %v2136_v33, %v1331_v8  ;;  %v2403_v28 = vld [vmem:[%s2602_s4] ss:$0 sm:$0xff] }
 0x25f   :  { %v1015_v14 = vmax.f32 %v910_v9, 0.0  ;;  %1471 = vst [vmem:[%s2605_s7 + $0xd0] sm:$0xff] %v1332_v10  ;;  %1636 = vmatmul.msk.f32.gmra.mxu3 %vm570_vm1, %v557_v13 }
 0x261   :  { %1684 = vmatmul.msk.f32.gmra.mxu2 %vm570_vm1, %v1015_v14 }
 0x264   :  { %v912_v17 = vpop.f32.mrf.mxu1  ;;  %v1334_v18 = vpop.f32.mrf.mxu2 }
 0x265   :  { %v913_v19 = vadd.f32 %v2403_v28, %v912_v17  ;;  %v1335_v20 = vadd.f32 %v2136_v33, %v1334_v18 }
 0x267   :  { %v1016_v21 = vmax.f32 %v913_v19, 0.0  ;;  %1472 = vst [vmem:[%s2605_s7 + $0xd8] sm:$0xff] %v1335_v20  ;;  %1637 = vmatmul.msk.f32.gmra.mxu3 %vm570_vm1, %v558_v16 }
 0x269   :  { %1685 = vmatmul.msk.f32.gmra.mxu2 %vm570_vm1, %v1016_v21 }
 0x26c   :  { %v915_v26 = vpop.f32.mrf.mxu1  ;;  %v1337_v27 = vpop.f32.mrf.mxu2 }
 0x26d   :  { %v916_v29 = vadd.f32 %v2403_v28, %v915_v26  ;;  %v1338_v30 = vadd.f32 %v2136_v33, %v1337_v27 }
 0x26f   :  { %v1017_v31 = vmax.f32 %v916_v29, 0.0  ;;  %1473 = vst [vmem:[%s2605_s7 + $0xe0] sm:$0xff] %v1338_v30  ;;  %1638 = vmatmul.msk.f32.gmra.mxu3 %vm570_vm1, %v559_v25 }
 0x271   :  { %1686 = vmatmul.msk.f32.gmra.mxu2 %vm570_vm1, %v1017_v31 }
 0x274   :  { %v918_v36 = vpop.f32.mrf.mxu1  ;;  %v1340_v37 = vpop.f32.mrf.mxu2 }
 0x275   :  { %v919_v38 = vadd.f32 %v2403_v28, %v918_v36  ;;  %v1341_v39 = vadd.f32 %v2136_v33, %v1340_v37 }
 0x277   :  { %v1018_v40 = vmax.f32 %v919_v38, 0.0  ;;  %1474 = vst [vmem:[%s2605_s7 + $0xe8] sm:$0xff] %v1341_v39  ;;  %1639 = vmatmul.msk.f32.gmra.mxu3 %vm570_vm1, %v560_v34 }
 0x279   :  { %1687 = vmatmul.msk.f32.gmra.mxu2 %vm570_vm1, %v1018_v40 }
 0x27c   :  { %v921_v43 = vpop.f32.mrf.mxu1  ;;  %v1343_v44 = vpop.f32.mrf.mxu2 }
 0x27d   :  { %v922_v45 = vadd.f32 %v2403_v28, %v921_v43  ;;  %v1344_v46 = vadd.f32 %v2136_v33, %v1343_v44 }
 0x27f   :  { %v1019_v47 = vmax.f32 %v922_v45, 0.0  ;;  %1475 = vst [vmem:[%s2605_s7 + $0xf0] sm:$0xff] %v1344_v46  ;;  %1640 = vmatmul.msk.f32.gmra.mxu3 %vm570_vm1, %v561_v42 }
 0x281   :  { %1688 = vmatmul.msk.f32.gmra.mxu2 %vm570_vm1, %v1019_v47 }
 0x284   :  { %v1346_v48 = vpop.f32.mrf.mxu2 }
 0x285   :  { %v1347_v22 = vadd.f32 %v2136_v33, %v1346_v48 }
 0x287   :  { %1476 = vst [vmem:[%s2605_s7 + $0xf8] sm:$0xff] %v1347_v22 }
 0x28a   :  { %v924_v49 = vpop.f32.mrf.mxu3 }
 0x28b   :  { %v925_v50 = vadd.f32 %v2403_v28, %v924_v49 }
 0x28c   :  { %v1349_v51 = vpop.f32.mrf.mxu2 }
 0x28d   :  { %v1020_v52 = vmax.f32 %v925_v50, 0.0  ;;  %v1350_v53 = vadd.f32 %v2136_v33, %v1349_v51 }
 0x28f   :  { %1477 = vst [vmem:[%s2605_s7 + $0x100] sm:$0xff] %v1350_v53  ;;  %1689 = vmatmul.msk.f32.vlgmr.msra.gmra.mxu3 %vm570_vm1, %v1020_v52 }
 0x292   :  { %v927_v54 = vpop.f32.mrf.mxu3 }
 0x293   :  { %v928_v55 = vadd.f32 %v2403_v28, %v927_v54 }
 0x294   :  { %v1352_v56 = vpop.f32.mrf.mxu2 }
 0x295   :  { %v1021_v57 = vmax.f32 %v928_v55, 0.0  ;;  %v1353_v58 = vadd.f32 %v2136_v33, %v1352_v56 }
 0x297   :  { %1478 = vst [vmem:[%s2605_s7 + $0x108] sm:$0xff] %v1353_v58  ;;  %1690 = vmatmul.msk.f32.gmra.mxu3 %vm570_vm1, %v1021_v57 }
 0x29a   :  { %v930_v59 = vpop.f32.mrf.mxu3 }
 0x29b   :  { %v931_v60 = vadd.f32 %v2403_v28, %v930_v59 }
 0x29c   :  { %v1355_v61 = vpop.f32.mrf.mxu2 }
 0x29d   :  { %v1022_v62 = vmax.f32 %v931_v60, 0.0  ;;  %v1356_v63 = vadd.f32 %v2136_v33, %v1355_v61 }
 0x29f   :  { %1479 = vst [vmem:[%s2605_s7 + $0x110] sm:$0xff] %v1356_v63  ;;  %1691 = vmatmul.msk.f32.gmra.mxu3 %vm570_vm1, %v1022_v62 }
 0x2a2   :  { %v933_v0 = vpop.f32.mrf.mxu3 }
 0x2a3   :  { %v934_v1 = vadd.f32 %v2403_v28, %v933_v0 }
 0x2a4   :  { %v1358_v2 = vpop.f32.mrf.mxu2 }
 0x2a5   :  { %v1023_v3 = vmax.f32 %v934_v1, 0.0  ;;  %v1359_v4 = vadd.f32 %v2136_v33, %v1358_v2 }
 0x2a7   :  { %1480 = vst [vmem:[%s2605_s7 + $0x118] sm:$0xff] %v1359_v4  ;;  %1692 = vmatmul.msk.f32.gmra.mxu3 %vm570_vm1, %v1023_v3 }
 0x2aa   :  { %v936_v7 = vpop.f32.mrf.mxu3 }
 0x2ab   :  { %v937_v5 = vadd.f32 %v2403_v28, %v936_v7 }
 0x2ac   :  { %v1361_v11 = vpop.f32.mrf.mxu2 }
 0x2ad   :  { %v1024_v13 = vmax.f32 %v937_v5, 0.0  ;;  %v1362_v6 = vadd.f32 %v2136_v33, %v1361_v11 }
 0x2af   :  { %1481 = vst [vmem:[%s2605_s7 + $0x120] sm:$0xff] %v1362_v6  ;;  %1693 = vmatmul.msk.f32.gmra.mxu3 %vm570_vm1, %v1024_v13 }
 0x2b2   :  { %v939_v8 = vpop.f32.mrf.mxu3 }
 0x2b3   :  { %v940_v9 = vadd.f32 %v2403_v28, %v939_v8 }
 0x2b4   :  { %v1364_v10 = vpop.f32.mrf.mxu2 }
 0x2b5   :  { %v1025_v14 = vmax.f32 %v940_v9, 0.0  ;;  %v1365_v12 = vadd.f32 %v2136_v33, %v1364_v10 }
 0x2b7   :  { %1482 = vst [vmem:[%s2605_s7 + $0x128] sm:$0xff] %v1365_v12  ;;  %1694 = vmatmul.msk.f32.gmra.mxu3 %vm570_vm1, %v1025_v14 }
 0x2ba   :  { %v942_v15 = vpop.f32.mrf.mxu3 }
 0x2bb   :  { %v943_v16 = vadd.f32 %v2403_v28, %v942_v15 }
 0x2bc   :  { %v1367_v17 = vpop.f32.mrf.mxu2 }
 0x2bd   :  { %v1026_v18 = vmax.f32 %v943_v16, 0.0  ;;  %v1368_v19 = vadd.f32 %v2136_v33, %v1367_v17 }
 0x2bf   :  { %1483 = vst [vmem:[%s2605_s7 + $0x130] sm:$0xff] %v1368_v19  ;;  %1695 = vmatmul.msk.f32.gmra.mxu3 %vm570_vm1, %v1026_v18 }
 0x2c2   :  { %v945_v20 = vpop.f32.mrf.mxu3 }
 0x2c3   :  { %v946_v21 = vadd.f32 %v2403_v28, %v945_v20 }
 0x2c4   :  { %v1370_v23 = vpop.f32.mrf.mxu2 }
 0x2c5   :  { %v1027_v24 = vmax.f32 %v946_v21, 0.0  ;;  %v1371_v25 = vadd.f32 %v2136_v33, %v1370_v23 }
 0x2c7   :  { %1484 = vst [vmem:[%s2605_s7 + $0x138] sm:$0xff] %v1371_v25  ;;  %1696 = vmatmul.msk.f32.gmra.mxu3 %vm570_vm1, %v1027_v24 }
 0x2ca   :  { %v948_v26 = vpop.f32.mrf.mxu3 }
 0x2cb   :  { %v949_v27 = vadd.f32 %v2403_v28, %v948_v26  ;;  %v1720_v26 = vld [vmem:[%s2604_s6] ss:$0 sm:$0xff] }
 0x2cc   :  { %v1373_v29 = vpop.f32.mrf.mxu2 }
 0x2cd   :  { %v1028_v30 = vmax.f32 %v949_v27, 0.0  ;;  %v1374_v31 = vadd.f32 %v2136_v33, %v1373_v29 }
 0x2cf   :  { %1485 = vst [vmem:[%s2605_s7 + $0x140] sm:$0xff] %v1374_v31  ;;  %1697 = vmatmul.msk.f32.gmra.mxu3 %vm570_vm1, %v1028_v30 }
 0x2d2   :  { %v951_v32 = vpop.f32.mrf.mxu3 }
 0x2d3   :  { %v952_v34 = vadd.f32 %v2403_v28, %v951_v32 }
 0x2d4   :  { %v1376_v35 = vpop.f32.mrf.mxu2 }
 0x2d5   :  { %v1029_v36 = vmax.f32 %v952_v34, 0.0  ;;  %v1377_v37 = vadd.f32 %v2136_v33, %v1376_v35 }
 0x2d7   :  { %1486 = vst [vmem:[%s2605_s7 + $0x148] sm:$0xff] %v1377_v37  ;;  %1698 = vmatmul.msk.f32.gmra.mxu3 %vm570_vm1, %v1029_v36 }
 0x2da   :  { %v954_v38 = vpop.f32.mrf.mxu3 }
 0x2db   :  { %v955_v39 = vadd.f32 %v2403_v28, %v954_v38 }
 0x2dc   :  { %v1379_v40 = vpop.f32.mrf.mxu2 }
 0x2dd   :  { %v1030_v41 = vmax.f32 %v955_v39, 0.0  ;;  %v1380_v42 = vadd.f32 %v2136_v33, %v1379_v40 }
 0x2df   :  { %1487 = vst [vmem:[%s2605_s7 + $0x150] sm:$0xff] %v1380_v42  ;;  %1699 = vmatmul.msk.f32.gmra.mxu3 %vm570_vm1, %v1030_v41 }
 0x2e2   :  { %v957_v43 = vpop.f32.mrf.mxu3 }
 0x2e3   :  { %v958_v44 = vadd.f32 %v2403_v28, %v957_v43 }
 0x2e4   :  { %v1382_v45 = vpop.f32.mrf.mxu2 }
 0x2e5   :  { %v1031_v46 = vmax.f32 %v958_v44, 0.0  ;;  %v1383_v47 = vadd.f32 %v2136_v33, %v1382_v45 }
 0x2e7   :  { %1488 = vst [vmem:[%s2605_s7 + $0x158] sm:$0xff] %v1383_v47  ;;  %1700 = vmatmul.msk.f32.gmra.mxu3 %vm570_vm1, %v1031_v46 }
 0x2ea   :  { %v960_v48 = vpop.f32.mrf.mxu3 }
 0x2eb   :  { %v961_v22 = vadd.f32 %v2403_v28, %v960_v48 }
 0x2ec   :  { %v1385_v49 = vpop.f32.mrf.mxu2 }
 0x2ed   :  { %v1032_v50 = vmax.f32 %v961_v22, 0.0  ;;  %v1386_v51 = vadd.f32 %v2136_v33, %v1385_v49 }
 0x2ef   :  { %1489 = vst [vmem:[%s2605_s7 + $0x160] sm:$0xff] %v1386_v51  ;;  %1701 = vmatmul.msk.f32.gmra.mxu3 %vm570_vm1, %v1032_v50 }
 0x2f2   :  { %v963_v52 = vpop.f32.mrf.mxu3 }
 0x2f3   :  { %v964_v53 = vadd.f32 %v2403_v28, %v963_v52 }
 0x2f4   :  { %v1388_v54 = vpop.f32.mrf.mxu2 }
 0x2f5   :  { %v1033_v55 = vmax.f32 %v964_v53, 0.0  ;;  %v1389_v56 = vadd.f32 %v2136_v33, %v1388_v54 }
 0x2f7   :  { %1490 = vst [vmem:[%s2605_s7 + $0x168] sm:$0xff] %v1389_v56  ;;  %1702 = vmatmul.msk.f32.gmra.mxu3 %vm570_vm1, %v1033_v55 }
 0x2fa   :  { %v966_v57 = vpop.f32.mrf.mxu3 }
 0x2fb   :  { %v967_v58 = vadd.f32 %v2403_v28, %v966_v57 }
 0x2fc   :  { %v1391_v59 = vpop.f32.mrf.mxu2 }
 0x2fd   :  { %v1034_v60 = vmax.f32 %v967_v58, 0.0  ;;  %v1392_v61 = vadd.f32 %v2136_v33, %v1391_v59 }
 0x2ff   :  { %1491 = vst [vmem:[%s2605_s7 + $0x170] sm:$0xff] %v1392_v61  ;;  %1703 = vmatmul.msk.f32.gmra.mxu3 %vm570_vm1, %v1034_v60 }
 0x302   :  { %v969_v62 = vpop.f32.mrf.mxu3 }
 0x303   :  { %v970_v63 = vadd.f32 %v2403_v28, %v969_v62 }
 0x304   :  { %v1394_v0 = vpop.f32.mrf.mxu2 }
 0x305   :  { %v1035_v1 = vmax.f32 %v970_v63, 0.0  ;;  %v1395_v2 = vadd.f32 %v2136_v33, %v1394_v0 }
 0x307   :  { %1492 = vst [vmem:[%s2605_s7 + $0x178] sm:$0xff] %v1395_v2  ;;  %1704 = vmatmul.msk.f32.gmra.mxu3 %vm570_vm1, %v1035_v1 }
 0x312   :  { %v1397_v3 = vpop.f32.mrf.mxu3 }
 0x313   :  { %v1398_v4 = vadd.f32 %v2136_v33, %v1397_v3 }
 0x315   :  { %1493 = vst [vmem:[%s2605_s7 + $0x180] sm:$0xff] %v1398_v4 }
 0x31a   :  { %v1400_v7 = vpop.f32.mrf.mxu3 }
 0x31b   :  { %v1401_v28 = vadd.f32 %v2136_v33, %v1400_v7 }
 0x31d   :  { %1494 = vst [vmem:[%s2605_s7 + $0x188] sm:$0xff] %v1401_v28 }
 0x322   :  { %v1403_v5 = vpop.f32.mrf.mxu3 }
 0x323   :  { %v1404_v11 = vadd.f32 %v2136_v33, %v1403_v5 }
 0x325   :  { %1495 = vst [vmem:[%s2605_s7 + $0x190] sm:$0xff] %v1404_v11 }
 0x32a   :  { %v1406_v13 = vpop.f32.mrf.mxu3 }
 0x32b   :  { %v1407_v6 = vadd.f32 %v2136_v33, %v1406_v13 }
 0x32d   :  { %1496 = vst [vmem:[%s2605_s7 + $0x198] sm:$0xff] %v1407_v6 }
 0x332   :  { %v1409_v8 = vpop.f32.mrf.mxu3 }
 0x333   :  { %v1410_v9 = vadd.f32 %v2136_v33, %v1409_v8 }
 0x335   :  { %1497 = vst [vmem:[%s2605_s7 + $0x1a0] sm:$0xff] %v1410_v9 }
 0x33a   :  { %v1412_v10 = vpop.f32.mrf.mxu3 }
 0x33b   :  { %v1413_v14 = vadd.f32 %v2136_v33, %v1412_v10 }
 0x33d   :  { %1498 = vst [vmem:[%s2605_s7 + $0x1a8] sm:$0xff] %v1413_v14 }
 0x342   :  { %v1415_v12 = vpop.f32.mrf.mxu3 }
 0x343   :  { %v1416_v15 = vadd.f32 %v2136_v33, %v1415_v12 }
 0x345   :  { %1499 = vst [vmem:[%s2605_s7 + $0x1b0] sm:$0xff] %v1416_v15 }
 0x34a   :  { %v1418_v16 = vpop.f32.mrf.mxu3 }
 0x34b   :  { %v1419_v17 = vadd.f32 %v2136_v33, %v1418_v16 }
 0x34d   :  { %1500 = vst [vmem:[%s2605_s7 + $0x1b8] sm:$0xff] %v1419_v17 }
 0x352   :  { %v1421_v18 = vpop.f32.mrf.mxu3 }
 0x353   :  { %v1422_v19 = vadd.f32 %v2136_v33, %v1421_v18 }
 0x355   :  { %1501 = vst [vmem:[%s2605_s7 + $0x1c0] sm:$0xff] %v1422_v19 }
 0x35a   :  { %v1424_v20 = vpop.f32.mrf.mxu3 }
 0x35b   :  { %v1425_v21 = vadd.f32 %v2136_v33, %v1424_v20 }
 0x35d   :  { %1502 = vst [vmem:[%s2605_s7 + $0x1c8] sm:$0xff] %v1425_v21 }
 0x362   :  { %v1427_v23 = vpop.f32.mrf.mxu3 }
 0x363   :  { %v1428_v24 = vadd.f32 %v2136_v33, %v1427_v23 }
 0x365   :  { %1503 = vst [vmem:[%s2605_s7 + $0x1d0] sm:$0xff] %v1428_v24 }
 0x36a   :  { %v1430_v25 = vpop.f32.mrf.mxu3 }
 0x36b   :  { %v1431_v27 = vadd.f32 %v1720_v26, %v1430_v25 }
 0x36d   :  { %1504 = vst [vmem:[%s2605_s7 + $0x1d8] sm:$0xff] %v1431_v27 }
 0x372   :  { %v1433_v29 = vpop.f32.mrf.mxu3 }
 0x373   :  { %v1434_v30 = vadd.f32 %v1720_v26, %v1433_v29 }
 0x375   :  { %1505 = vst [vmem:[%s2605_s7 + $0x1e0] sm:$0xff] %v1434_v30 }
 0x37a   :  { %v1436_v33 = vpop.f32.mrf.mxu3 }
 0x37b   :  { %v1437_v31 = vadd.f32 %v1720_v26, %v1436_v33 }
 0x37d   :  { %1506 = vst [vmem:[%s2605_s7 + $0x1e8] sm:$0xff] %v1437_v31 }
 0x382   :  { %v1439_v32 = vpop.f32.mrf.mxu3 }
 0x383   :  { %v1440_v34 = vadd.f32 %v1720_v26, %v1439_v32 }
 0x385   :  { %1507 = vst [vmem:[%s2605_s7 + $0x1f0] sm:$0xff] %v1440_v34 }
 0x38a   :  { %v1442_v35 = vpop.f32.mrf.mxu3 }
 0x38b   :  { %v1443_v36 = vadd.f32 %v1720_v26, %v1442_v35 }
 0x38d   :  { %1508 = vst [vmem:[%s2605_s7 + $0x1f8] sm:$0xff] %v1443_v36 }

</bundles_post_ra>
